<compile_context>
chip_gen: v6e
topology: v6e:2x2x1
jax: 0.10.0
libtpu: 0.0.40
codegen_flags: <defaults>
</compile_context>

<pallas_src>
import functools

import jax
import jax.numpy as jnp
from jax import lax
from jax.experimental import pallas as pl
from jax.experimental.pallas import tpu as pltpu


def _round_up(x, m):
    return (x + m - 1) // m * m


# ----------------------------- Pallas kernel --------------------------------
def lstm_recurrent_kernel(gx_ref, whh_ref, wfc_ref, bfc_ref, out_ref,
                          *, seq_len, hidden_dim, unroll):
    """Full time recurrence for one batch block in a single invocation.

    gx_ref : (T, B_blk, 4H) f32   precomputed x_t @ W_ih + (b_ih + b_hh)
    whh_ref: (H, 4H)        bf16  recurrent weights (f32 MXU accumulation)
    wfc_ref: (H, O_pad)     f32   final FC weights (lane-padded)
    bfc_ref: (1, O_pad)     f32
    out_ref: (B_blk, O_pad) f32
    """
    H = hidden_dim
    B_blk = gx_ref.shape[1]
    w_hh = whh_ref[...]                      # resident across the whole loop

    def step(t, carry):
        h, c = carry                         # (B_blk, H) f32 each
        gates = gx_ref[t] + jnp.dot(h.astype(w_hh.dtype), w_hh,
                                    preferred_element_type=jnp.float32)
        i_g = jax.nn.sigmoid(gates[:, 0 * H:1 * H])
        f_g = jax.nn.sigmoid(gates[:, 1 * H:2 * H])
        g_g = jnp.tanh(gates[:, 2 * H:3 * H])
        o_g = jax.nn.sigmoid(gates[:, 3 * H:4 * H])
        c_new = f_g * c + i_g * g_g
        h_new = o_g * jnp.tanh(c_new)
        return h_new, c_new

    h0 = jnp.zeros((B_blk, H), jnp.float32)   # PyTorch default h0 = c0 = 0
    c0 = jnp.zeros((B_blk, H), jnp.float32)
    h_T, _ = lax.fori_loop(0, seq_len, step, (h0, c0), unroll=unroll)

    # output[:, -1, :] == h_T  ->  fused FC, lane-dense (O padded to 128) store
    out_ref[...] = (jnp.dot(h_T, wfc_ref[...], preferred_element_type=jnp.float32)
                    + bfc_ref[...]).astype(out_ref.dtype)


# ------------------------------- wrapper -------------------------------------
def sentiment_lstm_forward(token_ids, params, *, batch_block=8):
    """token_ids: (B, T) int32.  Returns logits (B, output_dim) float32."""
    emb_table = params["embedding"]           # (V, E)
    w_ih = params["w_ih"]                     # (E, 4H)
    w_hh = params["w_hh"]                     # (H, 4H)
    b = params["b"]                           # (1, 4H)  (b_ih + b_hh)
    w_fc = params["w_fc"]                     # (H, O)
    b_fc = params["b_fc"]                     # (1, O)

    B, T = token_ids.shape
    E = emb_table.shape[1]
    H = w_hh.shape[0]
    O = w_fc.shape[1]

    # ---- XLA glue: embedding gather + hoisted input projection --------------
    # Transpose the cheap int32 id matrix, not the f32 activations.
    # TODO(synk): jnp.take clamps out-of-range token ids instead of erroring
    # like nn.Embedding.
    ids_tb = token_ids.T                                       # (T, B)
    x_tbe = jnp.take(emb_table, ids_tb, axis=0)                # (T, B, E)
    gates_x = jnp.dot(x_tbe.reshape(T * B, E), w_ih,
                      preferred_element_type=jnp.float32).reshape(T, B, 4 * H)
    gates_x = gates_x + b                                      # fold in b_ih + b_hh

    # ---- pad to TPU-friendly shapes ------------------------------------------
    B_blk = batch_block                                        # multiple of 8 sublanes
    B_pad = _round_up(max(B, 1), B_blk)
    O_pad = _round_up(O, 128)                                  # lane-dense final store

    if B_pad != B:
        gates_x = jnp.pad(gates_x, ((0, 0), (0, B_pad - B), (0, 0)))
    w_fc_p = jnp.pad(w_fc, ((0, 0), (0, O_pad - O))) if O_pad != O else w_fc
    b_fc_p = jnp.pad(b_fc, ((0, 0), (0, O_pad - O))) if O_pad != O else b_fc

    w_hh_mxu = w_hh.astype(jnp.bfloat16)       # bf16 MXU input, f32 accumulation

    kernel = functools.partial(lstm_recurrent_kernel,
                               seq_len=T, hidden_dim=H, unroll=bool(T <= 16))

    out_pad = pl.pallas_call(
        kernel,
        out_shape=jax.ShapeDtypeStruct((B_pad, O_pad), jnp.float32),
        grid_spec=pltpu.PrefetchScalarGridSpec(
            num_scalar_prefetch=0,
            grid=(B_pad // B_blk,),            # batch blocks (2 TCs on v7x)
            in_specs=[
                pl.BlockSpec((T, B_blk, 4 * H), lambda i: (0, i, 0)),  # gates_x
                pl.BlockSpec((H, 4 * H), lambda i: (0, 0)),            # W_hh
                pl.BlockSpec((H, O_pad), lambda i: (0, 0)),            # W_fc
                pl.BlockSpec((1, O_pad), lambda i: (0, 0)),            # b_fc
            ],
            out_specs=pl.BlockSpec((B_blk, O_pad), lambda i: (i, 0)),
        ),
        compiler_params=pltpu.CompilerParams(
            dimension_semantics=("parallel",),  # independent batch blocks
        ),
    )(gates_x, w_hh_mxu, w_fc_p, b_fc_p)

    return out_pad[:B, :O]


# -------------------------- deterministic params -----------------------------
def init_params(key, vocab_size, embed_dim, hidden_dim, output_dim):
    ks = jax.random.split(key, 7)
    s = 0.1
    emb = jax.random.normal(ks[0], (vocab_size, embed_dim), jnp.float32) * s
    w_ih = jax.random.normal(ks[1], (embed_dim, 4 * hidden_dim), jnp.float32) * s
    w_hh = jax.random.normal(ks[2], (hidden_dim, 4 * hidden_dim), jnp.float32) * s
    b_ih = jax.random.normal(ks[3], (4 * hidden_dim,), jnp.float32) * s
    b_hh = jax.random.normal(ks[4], (4 * hidden_dim,), jnp.float32) * s
    w_fc = jax.random.normal(ks[5], (hidden_dim, output_dim), jnp.float32) * s
    b_fc = jax.random.normal(ks[6], (output_dim,), jnp.float32) * s
    return {
        "embedding": emb,
        "w_ih": w_ih,
        "w_hh": w_hh,
        "b": (b_ih + b_hh).reshape(1, 4 * hidden_dim),
        "w_fc": w_fc,
        "b_fc": b_fc.reshape(1, output_dim),
    }


if __name__ == "__main__":
    # Module dims (embed/hidden/output match the PyTorch module); small vocab &
    # seq for a fast synthetic run.
    vocab_size = 1024      # reduced from 100684 for a small synthetic table
    embed_dim = 100
    hidden_dim = 128
    output_dim = 2
    batch = 2
    seq_len = 8

    key = jax.random.PRNGKey(0)
    k_tok, k_par = jax.random.split(key)
    token_ids = jax.random.randint(k_tok, (batch, seq_len), 0, vocab_size,
                                   dtype=jnp.int32)
    params = init_params(k_par, vocab_size, embed_dim, hidden_dim, output_dim)

    logits = jax.jit(sentiment_lstm_forward)(token_ids, params)
    logits = jax.block_until_ready(logits)

    assert logits.shape == (batch, output_dim)
    assert bool(jnp.all(jnp.isfinite(logits)))
    print("KERNEL_OK")
</pallas_src>

<mosaic_0001>
module attributes {stable_mosaic.version = 11 : i64} {
  func.func @lstm_recurrent_kernel(%arg0: i32, %arg1: memref<8x8x512xf32, #tpu.memory_space<vmem>>, %arg2: memref<128x512xbf16, #tpu.memory_space<vmem>>, %arg3: memref<128x128xf32, #tpu.memory_space<vmem>>, %arg4: memref<1x128xf32, #tpu.memory_space<vmem>>, %arg5: memref<8x128xf32, #tpu.memory_space<vmem>>) attributes {dimension_semantics = [#tpu.dimension_semantics<parallel>], iteration_bounds = array<i64: 1>, scalar_prefetch = 0 : i64, scratch_operands = 0 : i64, tpu.core_type = #tpu.core_type<tc>, window_params = [{transform_indices = @transform_0, window_bounds = array<i64: 8, 8, 512>}, {pipeline_mode = #tpu.pipeline_mode<synchronous>, transform_indices = @transform_1, window_bounds = array<i64: 128, 512>}, {pipeline_mode = #tpu.pipeline_mode<synchronous>, transform_indices = @transform_2, window_bounds = array<i64: 128, 128>}, {pipeline_mode = #tpu.pipeline_mode<synchronous>, transform_indices = @transform_3, window_bounds = array<i64: 1, 128>}, {transform_indices = @transform_4, window_bounds = array<i64: 8, 128>}]} {
    %c0 = arith.constant 0 : index
    %c0_0 = arith.constant 0 : index
    %0 = vector.load %arg2[%c0, %c0_0] : memref<128x512xbf16, #tpu.memory_space<vmem>>, vector<128x512xbf16>
    %cst = arith.constant 0.000000e+00 : f32
    %1 = vector.broadcast %cst : f32 to vector<8x128xf32>
    %cst_1 = arith.constant 0.000000e+00 : f32
    %2 = vector.broadcast %cst_1 : f32 to vector<8x128xf32>
    %c0_i32 = arith.constant 0 : i32
    %3 = arith.index_cast %c0_i32 : i32 to index
    %c0_2 = arith.constant 0 : index
    %c0_3 = arith.constant 0 : index
    %4 = vector.load %arg1[%3, %c0_2, %c0_3] : memref<8x8x512xf32, #tpu.memory_space<vmem>>, vector<1x8x512xf32>
    %5 = vector.shape_cast %4 : vector<1x8x512xf32> to vector<8x512xf32>
    %6 = arith.truncf %1 : vector<8x128xf32> to vector<8x128xbf16>
    %cst_4 = arith.constant dense<0.000000e+00> : vector<8x512xf32>
    %7 = tpu.matmul %6, %0, %cst_4 {dimension_numbers = #tpu.dot_dimension_numbers<[1], [0], [0], [1], [0, 0, 1, 1], [], []>} : vector<8x128xbf16>, vector<128x512xbf16>, vector<8x512xf32> -> vector<8x512xf32>
    %8 = arith.addf %5, %7 : vector<8x512xf32>
    %9 = vector.extract_strided_slice %8 {offsets = [0, 0], sizes = [8, 128], strides = [1, 1]} : vector<8x512xf32> to vector<8x128xf32>
    %10 = arith.negf %9 : vector<8x128xf32>
    %11 = math.exp %10 : vector<8x128xf32>
    %cst_5 = arith.constant 1.000000e+00 : f32
    %12 = vector.broadcast %cst_5 : f32 to vector<8x128xf32>
    %13 = arith.addf %12, %11 : vector<8x128xf32>
    %14 = arith.divf %12, %13 : vector<8x128xf32>
    %15 = vector.extract_strided_slice %8 {offsets = [0, 128], sizes = [8, 128], strides = [1, 1]} : vector<8x512xf32> to vector<8x128xf32>
    %16 = arith.negf %15 : vector<8x128xf32>
    %17 = math.exp %16 : vector<8x128xf32>
    %cst_6 = arith.constant 1.000000e+00 : f32
    %18 = vector.broadcast %cst_6 : f32 to vector<8x128xf32>
    %19 = arith.addf %18, %17 : vector<8x128xf32>
    %20 = arith.divf %18, %19 : vector<8x128xf32>
    %21 = vector.extract_strided_slice %8 {offsets = [0, 256], sizes = [8, 128], strides = [1, 1]} : vector<8x512xf32> to vector<8x128xf32>
    %22 = math.tanh %21 : vector<8x128xf32>
    %23 = vector.extract_strided_slice %8 {offsets = [0, 384], sizes = [8, 128], strides = [1, 1]} : vector<8x512xf32> to vector<8x128xf32>
    %24 = arith.negf %23 : vector<8x128xf32>
    %25 = math.exp %24 : vector<8x128xf32>
    %cst_7 = arith.constant 1.000000e+00 : f32
    %26 = vector.broadcast %cst_7 : f32 to vector<8x128xf32>
    %27 = arith.addf %26, %25 : vector<8x128xf32>
    %28 = arith.divf %26, %27 : vector<8x128xf32>
    %29 = arith.mulf %20, %2 : vector<8x128xf32>
    %30 = arith.mulf %14, %22 : vector<8x128xf32>
    %31 = arith.addf %29, %30 : vector<8x128xf32>
    %32 = math.tanh %31 : vector<8x128xf32>
    %33 = arith.mulf %28, %32 : vector<8x128xf32>
    %c1_i32 = arith.constant 1 : i32
    %34 = arith.index_cast %c1_i32 : i32 to index
    %c0_8 = arith.constant 0 : index
    %c0_9 = arith.constant 0 : index
    %35 = vector.load %arg1[%34, %c0_8, %c0_9] : memref<8x8x512xf32, #tpu.memory_space<vmem>>, vector<1x8x512xf32>
    %36 = vector.shape_cast %35 : vector<1x8x512xf32> to vector<8x512xf32>
    %37 = arith.truncf %33 : vector<8x128xf32> to vector<8x128xbf16>
    %cst_10 = arith.constant dense<0.000000e+00> : vector<8x512xf32>
    %38 = tpu.matmul %37, %0, %cst_10 {dimension_numbers = #tpu.dot_dimension_numbers<[1], [0], [0], [1], [0, 0, 1, 1], [], []>} : vector<8x128xbf16>, vector<128x512xbf16>, vector<8x512xf32> -> vector<8x512xf32>
    %39 = arith.addf %36, %38 : vector<8x512xf32>
    %40 = vector.extract_strided_slice %39 {offsets = [0, 0], sizes = [8, 128], strides = [1, 1]} : vector<8x512xf32> to vector<8x128xf32>
    %41 = arith.negf %40 : vector<8x128xf32>
    %42 = math.exp %41 : vector<8x128xf32>
    %cst_11 = arith.constant 1.000000e+00 : f32
    %43 = vector.broadcast %cst_11 : f32 to vector<8x128xf32>
    %44 = arith.addf %43, %42 : vector<8x128xf32>
    %45 = arith.divf %43, %44 : vector<8x128xf32>
    %46 = vector.extract_strided_slice %39 {offsets = [0, 128], sizes = [8, 128], strides = [1, 1]} : vector<8x512xf32> to vector<8x128xf32>
    %47 = arith.negf %46 : vector<8x128xf32>
    %48 = math.exp %47 : vector<8x128xf32>
    %cst_12 = arith.constant 1.000000e+00 : f32
    %49 = vector.broadcast %cst_12 : f32 to vector<8x128xf32>
    %50 = arith.addf %49, %48 : vector<8x128xf32>
    %51 = arith.divf %49, %50 : vector<8x128xf32>
    %52 = vector.extract_strided_slice %39 {offsets = [0, 256], sizes = [8, 128], strides = [1, 1]} : vector<8x512xf32> to vector<8x128xf32>
    %53 = math.tanh %52 : vector<8x128xf32>
    %54 = vector.extract_strided_slice %39 {offsets = [0, 384], sizes = [8, 128], strides = [1, 1]} : vector<8x512xf32> to vector<8x128xf32>
    %55 = arith.negf %54 : vector<8x128xf32>
    %56 = math.exp %55 : vector<8x128xf32>
    %cst_13 = arith.constant 1.000000e+00 : f32
    %57 = vector.broadcast %cst_13 : f32 to vector<8x128xf32>
    %58 = arith.addf %57, %56 : vector<8x128xf32>
    %59 = arith.divf %57, %58 : vector<8x128xf32>
    %60 = arith.mulf %51, %31 : vector<8x128xf32>
    %61 = arith.mulf %45, %53 : vector<8x128xf32>
    %62 = arith.addf %60, %61 : vector<8x128xf32>
    %63 = math.tanh %62 : vector<8x128xf32>
    %64 = arith.mulf %59, %63 : vector<8x128xf32>
    %c2_i32 = arith.constant 2 : i32
    %65 = arith.index_cast %c2_i32 : i32 to index
    %c0_14 = arith.constant 0 : index
    %c0_15 = arith.constant 0 : index
    %66 = vector.load %arg1[%65, %c0_14, %c0_15] : memref<8x8x512xf32, #tpu.memory_space<vmem>>, vector<1x8x512xf32>
    %67 = vector.shape_cast %66 : vector<1x8x512xf32> to vector<8x512xf32>
    %68 = arith.truncf %64 : vector<8x128xf32> to vector<8x128xbf16>
    %cst_16 = arith.constant dense<0.000000e+00> : vector<8x512xf32>
    %69 = tpu.matmul %68, %0, %cst_16 {dimension_numbers = #tpu.dot_dimension_numbers<[1], [0], [0], [1], [0, 0, 1, 1], [], []>} : vector<8x128xbf16>, vector<128x512xbf16>, vector<8x512xf32> -> vector<8x512xf32>
    %70 = arith.addf %67, %69 : vector<8x512xf32>
    %71 = vector.extract_strided_slice %70 {offsets = [0, 0], sizes = [8, 128], strides = [1, 1]} : vector<8x512xf32> to vector<8x128xf32>
    %72 = arith.negf %71 : vector<8x128xf32>
    %73 = math.exp %72 : vector<8x128xf32>
    %cst_17 = arith.constant 1.000000e+00 : f32
    %74 = vector.broadcast %cst_17 : f32 to vector<8x128xf32>
    %75 = arith.addf %74, %73 : vector<8x128xf32>
    %76 = arith.divf %74, %75 : vector<8x128xf32>
    %77 = vector.extract_strided_slice %70 {offsets = [0, 128], sizes = [8, 128], strides = [1, 1]} : vector<8x512xf32> to vector<8x128xf32>
    %78 = arith.negf %77 : vector<8x128xf32>
    %79 = math.exp %78 : vector<8x128xf32>
    %cst_18 = arith.constant 1.000000e+00 : f32
    %80 = vector.broadcast %cst_18 : f32 to vector<8x128xf32>
    %81 = arith.addf %80, %79 : vector<8x128xf32>
    %82 = arith.divf %80, %81 : vector<8x128xf32>
    %83 = vector.extract_strided_slice %70 {offsets = [0, 256], sizes = [8, 128], strides = [1, 1]} : vector<8x512xf32> to vector<8x128xf32>
    %84 = math.tanh %83 : vector<8x128xf32>
    %85 = vector.extract_strided_slice %70 {offsets = [0, 384], sizes = [8, 128], strides = [1, 1]} : vector<8x512xf32> to vector<8x128xf32>
    %86 = arith.negf %85 : vector<8x128xf32>
    %87 = math.exp %86 : vector<8x128xf32>
    %cst_19 = arith.constant 1.000000e+00 : f32
    %88 = vector.broadcast %cst_19 : f32 to vector<8x128xf32>
    %89 = arith.addf %88, %87 : vector<8x128xf32>
    %90 = arith.divf %88, %89 : vector<8x128xf32>
    %91 = arith.mulf %82, %62 : vector<8x128xf32>
    %92 = arith.mulf %76, %84 : vector<8x128xf32>
    %93 = arith.addf %91, %92 : vector<8x128xf32>
    %94 = math.tanh %93 : vector<8x128xf32>
    %95 = arith.mulf %90, %94 : vector<8x128xf32>
    %c3_i32 = arith.constant 3 : i32
    %96 = arith.index_cast %c3_i32 : i32 to index
    %c0_20 = arith.constant 0 : index
    %c0_21 = arith.constant 0 : index
    %97 = vector.load %arg1[%96, %c0_20, %c0_21] : memref<8x8x512xf32, #tpu.memory_space<vmem>>, vector<1x8x512xf32>
    %98 = vector.shape_cast %97 : vector<1x8x512xf32> to vector<8x512xf32>
    %99 = arith.truncf %95 : vector<8x128xf32> to vector<8x128xbf16>
    %cst_22 = arith.constant dense<0.000000e+00> : vector<8x512xf32>
    %100 = tpu.matmul %99, %0, %cst_22 {dimension_numbers = #tpu.dot_dimension_numbers<[1], [0], [0], [1], [0, 0, 1, 1], [], []>} : vector<8x128xbf16>, vector<128x512xbf16>, vector<8x512xf32> -> vector<8x512xf32>
    %101 = arith.addf %98, %100 : vector<8x512xf32>
    %102 = vector.extract_strided_slice %101 {offsets = [0, 0], sizes = [8, 128], strides = [1, 1]} : vector<8x512xf32> to vector<8x128xf32>
    %103 = arith.negf %102 : vector<8x128xf32>
    %104 = math.exp %103 : vector<8x128xf32>
    %cst_23 = arith.constant 1.000000e+00 : f32
    %105 = vector.broadcast %cst_23 : f32 to vector<8x128xf32>
    %106 = arith.addf %105, %104 : vector<8x128xf32>
    %107 = arith.divf %105, %106 : vector<8x128xf32>
    %108 = vector.extract_strided_slice %101 {offsets = [0, 128], sizes = [8, 128], strides = [1, 1]} : vector<8x512xf32> to vector<8x128xf32>
    %109 = arith.negf %108 : vector<8x128xf32>
    %110 = math.exp %109 : vector<8x128xf32>
    %cst_24 = arith.constant 1.000000e+00 : f32
    %111 = vector.broadcast %cst_24 : f32 to vector<8x128xf32>
    %112 = arith.addf %111, %110 : vector<8x128xf32>
    %113 = arith.divf %111, %112 : vector<8x128xf32>
    %114 = vector.extract_strided_slice %101 {offsets = [0, 256], sizes = [8, 128], strides = [1, 1]} : vector<8x512xf32> to vector<8x128xf32>
    %115 = math.tanh %114 : vector<8x128xf32>
    %116 = vector.extract_strided_slice %101 {offsets = [0, 384], sizes = [8, 128], strides = [1, 1]} : vector<8x512xf32> to vector<8x128xf32>
    %117 = arith.negf %116 : vector<8x128xf32>
    %118 = math.exp %117 : vector<8x128xf32>
    %cst_25 = arith.constant 1.000000e+00 : f32
    %119 = vector.broadcast %cst_25 : f32 to vector<8x128xf32>
    %120 = arith.addf %119, %118 : vector<8x128xf32>
    %121 = arith.divf %119, %120 : vector<8x128xf32>
    %122 = arith.mulf %113, %93 : vector<8x128xf32>
    %123 = arith.mulf %107, %115 : vector<8x128xf32>
    %124 = arith.addf %122, %123 : vector<8x128xf32>
    %125 = math.tanh %124 : vector<8x128xf32>
    %126 = arith.mulf %121, %125 : vector<8x128xf32>
    %c4_i32 = arith.constant 4 : i32
    %127 = arith.index_cast %c4_i32 : i32 to index
    %c0_26 = arith.constant 0 : index
    %c0_27 = arith.constant 0 : index
    %128 = vector.load %arg1[%127, %c0_26, %c0_27] : memref<8x8x512xf32, #tpu.memory_space<vmem>>, vector<1x8x512xf32>
    %129 = vector.shape_cast %128 : vector<1x8x512xf32> to vector<8x512xf32>
    %130 = arith.truncf %126 : vector<8x128xf32> to vector<8x128xbf16>
    %cst_28 = arith.constant dense<0.000000e+00> : vector<8x512xf32>
    %131 = tpu.matmul %130, %0, %cst_28 {dimension_numbers = #tpu.dot_dimension_numbers<[1], [0], [0], [1], [0, 0, 1, 1], [], []>} : vector<8x128xbf16>, vector<128x512xbf16>, vector<8x512xf32> -> vector<8x512xf32>
    %132 = arith.addf %129, %131 : vector<8x512xf32>
    %133 = vector.extract_strided_slice %132 {offsets = [0, 0], sizes = [8, 128], strides = [1, 1]} : vector<8x512xf32> to vector<8x128xf32>
    %134 = arith.negf %133 : vector<8x128xf32>
    %135 = math.exp %134 : vector<8x128xf32>
    %cst_29 = arith.constant 1.000000e+00 : f32
    %136 = vector.broadcast %cst_29 : f32 to vector<8x128xf32>
    %137 = arith.addf %136, %135 : vector<8x128xf32>
    %138 = arith.divf %136, %137 : vector<8x128xf32>
    %139 = vector.extract_strided_slice %132 {offsets = [0, 128], sizes = [8, 128], strides = [1, 1]} : vector<8x512xf32> to vector<8x128xf32>
    %140 = arith.negf %139 : vector<8x128xf32>
    %141 = math.exp %140 : vector<8x128xf32>
    %cst_30 = arith.constant 1.000000e+00 : f32
    %142 = vector.broadcast %cst_30 : f32 to vector<8x128xf32>
    %143 = arith.addf %142, %141 : vector<8x128xf32>
    %144 = arith.divf %142, %143 : vector<8x128xf32>
    %145 = vector.extract_strided_slice %132 {offsets = [0, 256], sizes = [8, 128], strides = [1, 1]} : vector<8x512xf32> to vector<8x128xf32>
    %146 = math.tanh %145 : vector<8x128xf32>
    %147 = vector.extract_strided_slice %132 {offsets = [0, 384], sizes = [8, 128], strides = [1, 1]} : vector<8x512xf32> to vector<8x128xf32>
    %148 = arith.negf %147 : vector<8x128xf32>
    %149 = math.exp %148 : vector<8x128xf32>
    %cst_31 = arith.constant 1.000000e+00 : f32
    %150 = vector.broadcast %cst_31 : f32 to vector<8x128xf32>
    %151 = arith.addf %150, %149 : vector<8x128xf32>
    %152 = arith.divf %150, %151 : vector<8x128xf32>
    %153 = arith.mulf %144, %124 : vector<8x128xf32>
    %154 = arith.mulf %138, %146 : vector<8x128xf32>
    %155 = arith.addf %153, %154 : vector<8x128xf32>
    %156 = math.tanh %155 : vector<8x128xf32>
    %157 = arith.mulf %152, %156 : vector<8x128xf32>
    %c5_i32 = arith.constant 5 : i32
    %158 = arith.index_cast %c5_i32 : i32 to index
    %c0_32 = arith.constant 0 : index
    %c0_33 = arith.constant 0 : index
    %159 = vector.load %arg1[%158, %c0_32, %c0_33] : memref<8x8x512xf32, #tpu.memory_space<vmem>>, vector<1x8x512xf32>
    %160 = vector.shape_cast %159 : vector<1x8x512xf32> to vector<8x512xf32>
    %161 = arith.truncf %157 : vector<8x128xf32> to vector<8x128xbf16>
    %cst_34 = arith.constant dense<0.000000e+00> : vector<8x512xf32>
    %162 = tpu.matmul %161, %0, %cst_34 {dimension_numbers = #tpu.dot_dimension_numbers<[1], [0], [0], [1], [0, 0, 1, 1], [], []>} : vector<8x128xbf16>, vector<128x512xbf16>, vector<8x512xf32> -> vector<8x512xf32>
    %163 = arith.addf %160, %162 : vector<8x512xf32>
    %164 = vector.extract_strided_slice %163 {offsets = [0, 0], sizes = [8, 128], strides = [1, 1]} : vector<8x512xf32> to vector<8x128xf32>
    %165 = arith.negf %164 : vector<8x128xf32>
    %166 = math.exp %165 : vector<8x128xf32>
    %cst_35 = arith.constant 1.000000e+00 : f32
    %167 = vector.broadcast %cst_35 : f32 to vector<8x128xf32>
    %168 = arith.addf %167, %166 : vector<8x128xf32>
    %169 = arith.divf %167, %168 : vector<8x128xf32>
    %170 = vector.extract_strided_slice %163 {offsets = [0, 128], sizes = [8, 128], strides = [1, 1]} : vector<8x512xf32> to vector<8x128xf32>
    %171 = arith.negf %170 : vector<8x128xf32>
    %172 = math.exp %171 : vector<8x128xf32>
    %cst_36 = arith.constant 1.000000e+00 : f32
    %173 = vector.broadcast %cst_36 : f32 to vector<8x128xf32>
    %174 = arith.addf %173, %172 : vector<8x128xf32>
    %175 = arith.divf %173, %174 : vector<8x128xf32>
    %176 = vector.extract_strided_slice %163 {offsets = [0, 256], sizes = [8, 128], strides = [1, 1]} : vector<8x512xf32> to vector<8x128xf32>
    %177 = math.tanh %176 : vector<8x128xf32>
    %178 = vector.extract_strided_slice %163 {offsets = [0, 384], sizes = [8, 128], strides = [1, 1]} : vector<8x512xf32> to vector<8x128xf32>
    %179 = arith.negf %178 : vector<8x128xf32>
    %180 = math.exp %179 : vector<8x128xf32>
    %cst_37 = arith.constant 1.000000e+00 : f32
    %181 = vector.broadcast %cst_37 : f32 to vector<8x128xf32>
    %182 = arith.addf %181, %180 : vector<8x128xf32>
    %183 = arith.divf %181, %182 : vector<8x128xf32>
    %184 = arith.mulf %175, %155 : vector<8x128xf32>
    %185 = arith.mulf %169, %177 : vector<8x128xf32>
    %186 = arith.addf %184, %185 : vector<8x128xf32>
    %187 = math.tanh %186 : vector<8x128xf32>
    %188 = arith.mulf %183, %187 : vector<8x128xf32>
    %c6_i32 = arith.constant 6 : i32
    %189 = arith.index_cast %c6_i32 : i32 to index
    %c0_38 = arith.constant 0 : index
    %c0_39 = arith.constant 0 : index
    %190 = vector.load %arg1[%189, %c0_38, %c0_39] : memref<8x8x512xf32, #tpu.memory_space<vmem>>, vector<1x8x512xf32>
    %191 = vector.shape_cast %190 : vector<1x8x512xf32> to vector<8x512xf32>
    %192 = arith.truncf %188 : vector<8x128xf32> to vector<8x128xbf16>
    %cst_40 = arith.constant dense<0.000000e+00> : vector<8x512xf32>
    %193 = tpu.matmul %192, %0, %cst_40 {dimension_numbers = #tpu.dot_dimension_numbers<[1], [0], [0], [1], [0, 0, 1, 1], [], []>} : vector<8x128xbf16>, vector<128x512xbf16>, vector<8x512xf32> -> vector<8x512xf32>
    %194 = arith.addf %191, %193 : vector<8x512xf32>
    %195 = vector.extract_strided_slice %194 {offsets = [0, 0], sizes = [8, 128], strides = [1, 1]} : vector<8x512xf32> to vector<8x128xf32>
    %196 = arith.negf %195 : vector<8x128xf32>
    %197 = math.exp %196 : vector<8x128xf32>
    %cst_41 = arith.constant 1.000000e+00 : f32
    %198 = vector.broadcast %cst_41 : f32 to vector<8x128xf32>
    %199 = arith.addf %198, %197 : vector<8x128xf32>
    %200 = arith.divf %198, %199 : vector<8x128xf32>
    %201 = vector.extract_strided_slice %194 {offsets = [0, 128], sizes = [8, 128], strides = [1, 1]} : vector<8x512xf32> to vector<8x128xf32>
    %202 = arith.negf %201 : vector<8x128xf32>
    %203 = math.exp %202 : vector<8x128xf32>
    %cst_42 = arith.constant 1.000000e+00 : f32
    %204 = vector.broadcast %cst_42 : f32 to vector<8x128xf32>
    %205 = arith.addf %204, %203 : vector<8x128xf32>
    %206 = arith.divf %204, %205 : vector<8x128xf32>
    %207 = vector.extract_strided_slice %194 {offsets = [0, 256], sizes = [8, 128], strides = [1, 1]} : vector<8x512xf32> to vector<8x128xf32>
    %208 = math.tanh %207 : vector<8x128xf32>
    %209 = vector.extract_strided_slice %194 {offsets = [0, 384], sizes = [8, 128], strides = [1, 1]} : vector<8x512xf32> to vector<8x128xf32>
    %210 = arith.negf %209 : vector<8x128xf32>
    %211 = math.exp %210 : vector<8x128xf32>
    %cst_43 = arith.constant 1.000000e+00 : f32
    %212 = vector.broadcast %cst_43 : f32 to vector<8x128xf32>
    %213 = arith.addf %212, %211 : vector<8x128xf32>
    %214 = arith.divf %212, %213 : vector<8x128xf32>
    %215 = arith.mulf %206, %186 : vector<8x128xf32>
    %216 = arith.mulf %200, %208 : vector<8x128xf32>
    %217 = arith.addf %215, %216 : vector<8x128xf32>
    %218 = math.tanh %217 : vector<8x128xf32>
    %219 = arith.mulf %214, %218 : vector<8x128xf32>
    %c7_i32 = arith.constant 7 : i32
    %220 = arith.index_cast %c7_i32 : i32 to index
    %c0_44 = arith.constant 0 : index
    %c0_45 = arith.constant 0 : index
    %221 = vector.load %arg1[%220, %c0_44, %c0_45] : memref<8x8x512xf32, #tpu.memory_space<vmem>>, vector<1x8x512xf32>
    %222 = vector.shape_cast %221 : vector<1x8x512xf32> to vector<8x512xf32>
    %223 = arith.truncf %219 : vector<8x128xf32> to vector<8x128xbf16>
    %cst_46 = arith.constant dense<0.000000e+00> : vector<8x512xf32>
    %224 = tpu.matmul %223, %0, %cst_46 {dimension_numbers = #tpu.dot_dimension_numbers<[1], [0], [0], [1], [0, 0, 1, 1], [], []>} : vector<8x128xbf16>, vector<128x512xbf16>, vector<8x512xf32> -> vector<8x512xf32>
    %225 = arith.addf %222, %224 : vector<8x512xf32>
    %226 = vector.extract_strided_slice %225 {offsets = [0, 0], sizes = [8, 128], strides = [1, 1]} : vector<8x512xf32> to vector<8x128xf32>
    %227 = arith.negf %226 : vector<8x128xf32>
    %228 = math.exp %227 : vector<8x128xf32>
    %cst_47 = arith.constant 1.000000e+00 : f32
    %229 = vector.broadcast %cst_47 : f32 to vector<8x128xf32>
    %230 = arith.addf %229, %228 : vector<8x128xf32>
    %231 = arith.divf %229, %230 : vector<8x128xf32>
    %232 = vector.extract_strided_slice %225 {offsets = [0, 128], sizes = [8, 128], strides = [1, 1]} : vector<8x512xf32> to vector<8x128xf32>
    %233 = arith.negf %232 : vector<8x128xf32>
    %234 = math.exp %233 : vector<8x128xf32>
    %cst_48 = arith.constant 1.000000e+00 : f32
    %235 = vector.broadcast %cst_48 : f32 to vector<8x128xf32>
    %236 = arith.addf %235, %234 : vector<8x128xf32>
    %237 = arith.divf %235, %236 : vector<8x128xf32>
    %238 = vector.extract_strided_slice %225 {offsets = [0, 256], sizes = [8, 128], strides = [1, 1]} : vector<8x512xf32> to vector<8x128xf32>
    %239 = math.tanh %238 : vector<8x128xf32>
    %240 = vector.extract_strided_slice %225 {offsets = [0, 384], sizes = [8, 128], strides = [1, 1]} : vector<8x512xf32> to vector<8x128xf32>
    %241 = arith.negf %240 : vector<8x128xf32>
    %242 = math.exp %241 : vector<8x128xf32>
    %cst_49 = arith.constant 1.000000e+00 : f32
    %243 = vector.broadcast %cst_49 : f32 to vector<8x128xf32>
    %244 = arith.addf %243, %242 : vector<8x128xf32>
    %245 = arith.divf %243, %244 : vector<8x128xf32>
    %246 = arith.mulf %237, %217 : vector<8x128xf32>
    %247 = arith.mulf %231, %239 : vector<8x128xf32>
    %248 = arith.addf %246, %247 : vector<8x128xf32>
    %249 = math.tanh %248 : vector<8x128xf32>
    %250 = arith.mulf %245, %249 : vector<8x128xf32>
    %c8_i32 = arith.constant 8 : i32
    %c0_50 = arith.constant 0 : index
    %c0_51 = arith.constant 0 : index
    %251 = vector.load %arg3[%c0_50, %c0_51] : memref<128x128xf32, #tpu.memory_space<vmem>>, vector<128x128xf32>
    %cst_52 = arith.constant dense<0.000000e+00> : vector<8x128xf32>
    %252 = tpu.matmul %250, %251, %cst_52 {dimension_numbers = #tpu.dot_dimension_numbers<[1], [0], [0], [1], [0, 0, 1, 1], [], []>} : vector<8x128xf32>, vector<128x128xf32>, vector<8x128xf32> -> vector<8x128xf32>
    %c0_53 = arith.constant 0 : index
    %c0_54 = arith.constant 0 : index
    %253 = vector.load %arg4[%c0_53, %c0_54] : memref<1x128xf32, #tpu.memory_space<vmem>>, vector<1x128xf32>
    %254 = vector.broadcast %253 : vector<1x128xf32> to vector<8x128xf32>
    %255 = arith.addf %252, %254 : vector<8x128xf32>
    %c0_55 = arith.constant 0 : index
    %c0_56 = arith.constant 0 : index
    %256 = vector.load %arg5[%c0_55, %c0_56] : memref<8x128xf32, #tpu.memory_space<vmem>>, vector<8x128xf32>
    tpu.vector_store %arg5[%c0_55, %c0_56], %255 {strides = array<i32>} : memref<8x128xf32, #tpu.memory_space<vmem>>, vector<8x128xf32>,
    return
  }
  func.func @transform_0(%arg0: i32) -> (i32, i32, i32) {
    %c0_i32 = arith.constant 0 : i32
    %c0_i32_0 = arith.constant 0 : i32
    %c0_i32_1 = arith.constant 0 : i32
    return %c0_i32, %arg0, %c0_i32_0 : i32, i32, i32
  }
  func.func @transform_1(%arg0: i32) -> (i32, i32) {
    %c0_i32 = arith.constant 0 : i32
    %c0_i32_0 = arith.constant 0 : i32
    %c0_i32_1 = arith.constant 0 : i32
    return %c0_i32, %c0_i32_0 : i32, i32
  }
  func.func @transform_2(%arg0: i32) -> (i32, i32) {
    %c0_i32 = arith.constant 0 : i32
    %c0_i32_0 = arith.constant 0 : i32
    %c0_i32_1 = arith.constant 0 : i32
    return %c0_i32, %c0_i32_0 : i32, i32
  }
  func.func @transform_3(%arg0: i32) -> (i32, i32) {
    %c0_i32 = arith.constant 0 : i32
    %c0_i32_0 = arith.constant 0 : i32
    %c0_i32_1 = arith.constant 0 : i32
    return %c0_i32, %c0_i32_0 : i32, i32
  }
  func.func @transform_4(%arg0: i32) -> (i32, i32) {
    %c0_i32 = arith.constant 0 : i32
    %c0_i32_0 = arith.constant 0 : i32
    return %arg0, %c0_i32 : i32, i32
  }
}

</mosaic_0001>

<bundles_post_ra>
// kernel: sentiment_lstm_forward.1
= control target key start
LH: loop header
LB: loop body
LE: loop exit
PB: predicated region body
PF: predicated region fallthrough
CT: control target
= control target key end

     0   :  { %v1581_v1 = vmov 0   ;;  %vm1583_vm0 = vmmov 0   ;;  %s2283_s1 = inlined_call_operand.vmem [shape: bf16[128,512], index: 1, kind: input, shape index: {}]   ;;  %s2284_s0 = inlined_call_operand.vmem [shape: f32[8,8,512], index: 0, kind: input, shape index: {}]   ;;  %s2285_s2 = inlined_call_operand.vmem [shape: f32[128,128], index: 2, kind: input, shape index: {}]   ;;  %s2286_s3 = inlined_call_operand.vmem [shape: f32[1,128], index: 3, kind: input, shape index: {}]   ;;  %s2287_s4 = inlined_call_operand.vmem [shape: f32[8,128], index: 4, kind: output, shape index: {}]  }
   0x1   :  { %v1612_v0 = vld [vmem:[%s2283_s1 + $0xe4] ss:$16 sps:$4 sm:$0xff]   ;;  %246 = vmatprep.mubr.bf16.mxu0 %v1581_v1  ;;  %287 = vmatprep.mubr.bf16.mxu1 %v1581_v1  ;;  %v1619_v2 = vld [vmem:[%s2283_s1 + $0xe0] ss:$16 sps:$4 sm:$0xff]   ;;  %v1642_v6 = vld [vmem:[%s2283_s1 + $0xec] ss:$16 sps:$4 sm:$0xff]  }
   0x2   :  { %214 = vmatprep.subr.bf16.mxu0 %v1612_v0  ;;  %v1625_v3 = vld [vmem:[%s2283_s1 + $0xc4] ss:$16 sps:$4 sm:$0xff]   ;;  %v1631_v4 = vld [vmem:[%s2283_s1 + $0xc0] ss:$16 sps:$4 sm:$0xff]   ;;  %v1647_v7 = vld [vmem:[%s2283_s1 + $0xe8] ss:$16 sps:$4 sm:$0xff]   ;;  %255 = vmatprep.subr.bf16.mxu1 %v1642_v6 }
   0x3   :  { %215 = vmatpush1.bf16.msra.mxu0 %v1619_v2  ;;  %v1637_v5 = vld [vmem:[%s2283_s1 + $0xa4] ss:$16 sps:$4 sm:$0xff]   ;;  %v1653_v8 = vld [vmem:[%s2283_s1 + $0xa0] ss:$16 sps:$4 sm:$0xff]   ;;  %256 = vmatpush1.bf16.msra.mxu1 %v1647_v7  ;;  %v1666_v10 = vld [vmem:[%s2283_s1 + $0xcc] ss:$16 sps:$4 sm:$0xff]  }
   0x4   :  { %216 = vmatprep.subr.bf16.mxu0 %v1625_v3  ;;  %v1660_v9 = vld [vmem:[%s2283_s1 + $0x84] ss:$16 sps:$4 sm:$0xff]   ;;  %v1671_v11 = vld [vmem:[%s2283_s1 + $0xc8] ss:$16 sps:$4 sm:$0xff]   ;;  %257 = vmatprep.subr.bf16.mxu1 %v1666_v10  ;;  %v1678_v12 = vld [vmem:[%s2283_s1 + $0x80] ss:$16 sps:$4 sm:$0xff]  }
   0x5   :  { %v1683_v13 = vld [vmem:[%s2283_s1 + $0x64] ss:$16 sps:$4 sm:$0xff]   ;;  %v1688_v14 = vld [vmem:[%s2283_s1 + $0xac] ss:$16 sps:$4 sm:$0xff]   ;;  %v1695_v15 = vld [vmem:[%s2283_s1 + $0xa8] ss:$16 sps:$4 sm:$0xff]  }
   0x6   :  { %v1701_v16 = vld [vmem:[%s2283_s1 + $0x8c] ss:$16 sps:$4 sm:$0xff]   ;;  %v1707_v17 = vld [vmem:[%s2283_s1 + $0x60] ss:$16 sps:$4 sm:$0xff]   ;;  %v1713_v18 = vld [vmem:[%s2283_s1 + $0x44] ss:$16 sps:$4 sm:$0xff]  }
   0x7   :  { %217 = vmatpush1.bf16.msra.mxu0 %v1631_v4  ;;  %258 = vmatpush1.bf16.msra.mxu1 %v1671_v11  ;;  %v1719_v19 = vld [vmem:[%s2283_s1 + $0x88] ss:$16 sps:$4 sm:$0xff]   ;;  %v1725_v20 = vld [vmem:[%s2283_s1 + $0x6c] ss:$16 sps:$4 sm:$0xff]   ;;  %v1731_v21 = vld [vmem:[%s2283_s1 + $0x40] ss:$16 sps:$4 sm:$0xff]  }
   0x8   :  { %218 = vmatprep.subr.bf16.mxu0 %v1637_v5  ;;  %259 = vmatprep.subr.bf16.mxu1 %v1688_v14  ;;  %v1736_v22 = vld [vmem:[%s2283_s1 + $0x24] ss:$16 sps:$4 sm:$0xff]   ;;  %v1743_v23 = vld [vmem:[%s2283_s1 + $0x68] ss:$16 sps:$4 sm:$0xff]   ;;  %v1749_v24 = vld [vmem:[%s2283_s1 + $0x4c] ss:$16 sps:$4 sm:$0xff]  }
   0x9   :  { %v1755_v25 = vld [vmem:[%s2283_s1 + $0x20] ss:$16 sps:$4 sm:$0xff]   ;;  %v1761_v26 = vld [vmem:[%s2283_s1 + $0x4] ss:$16 sps:$4 sm:$0xff]   ;;  %v1767_v27 = vld [vmem:[%s2283_s1 + $0x48] ss:$16 sps:$4 sm:$0xff]  }
   0xa   :  { %v1773_v28 = vld [vmem:[%s2283_s1 + $0x2c] ss:$16 sps:$4 sm:$0xff]   ;;  %v1779_v29 = vld [vmem:[%s2283_s1] ss:$16 sps:$4 sm:$0xff]   ;;  %v1786_v30 = vld [vmem:[%s2283_s1 + $0x28] ss:$16 sps:$4 sm:$0xff]  }
   0xb   :  { %219 = vmatpush1.bf16.msra.mxu0 %v1653_v8  ;;  %260 = vmatpush1.bf16.msra.mxu1 %v1695_v15  ;;  %v1792_v31 = vld [vmem:[%s2283_s1 + $0xc] ss:$16 sps:$4 sm:$0xff]   ;;  %v1799_v32 = vld [vmem:[%s2283_s1 + $0x8] ss:$16 sps:$4 sm:$0xff]   ;;  %v50_v33 = vld [vmem:[%s2284_s0] sm:$0xff] }
   0xc   :  { %220 = vmatprep.subr.bf16.mxu0 %v1660_v9  ;;  %261 = vmatprep.subr.bf16.mxu1 %v1701_v16  ;;  %v51_v35 = vld [vmem:[%s2284_s0 + $0x8] sm:$0xff]  ;;  %v53_v45 = vld [vmem:[%s2284_s0 + $0x18] sm:$0xff]  ;;  %v52_v48 = vld [vmem:[%s2284_s0 + $0x10] sm:$0xff] }
   0xf   :  { %221 = vmatpush1.bf16.msra.mxu0 %v1678_v12  ;;  %262 = vmatpush1.bf16.msra.mxu1 %v1719_v19 }
  0x10   :  { %222 = vmatprep.subr.bf16.mxu0 %v1683_v13  ;;  %263 = vmatprep.subr.bf16.mxu1 %v1725_v20 }
  0x13   :  { %223 = vmatpush1.bf16.msra.mxu0 %v1707_v17  ;;  %264 = vmatpush1.bf16.msra.mxu1 %v1743_v23 }
  0x14   :  { %224 = vmatprep.subr.bf16.mxu0 %v1713_v18  ;;  %265 = vmatprep.subr.bf16.mxu1 %v1749_v24 }
  0x17   :  { %225 = vmatpush1.bf16.msra.mxu0 %v1731_v21  ;;  %266 = vmatpush1.bf16.msra.mxu1 %v1767_v27 }
  0x18   :  { %226 = vmatprep.subr.bf16.mxu0 %v1736_v22  ;;  %267 = vmatprep.subr.bf16.mxu1 %v1773_v28 }
  0x1b   :  { %227 = vmatpush1.bf16.msra.mxu0 %v1755_v25  ;;  %268 = vmatpush1.bf16.msra.mxu1 %v1786_v30 }
  0x1c   :  { %228 = vmatprep.subr.bf16.mxu0 %v1761_v26  ;;  %269 = vmatprep.subr.bf16.mxu1 %v1792_v31 }
  0x1f   :  { %229 = vmatpush1.bf16.msra.mxu0 %v1779_v29  ;;  %270 = vmatpush1.bf16.msra.mxu1 %v1799_v32 }
  0x20   :  { %330 = vmatprep.subr.bf16.mxu0 %v1612_v0  ;;  %371 = vmatprep.subr.bf16.mxu1 %v1642_v6 }
  0x22   :  { %247 = vmatmul.mubr.bf16.vlgmr.msra.gmra.mxu0 %v1581_v1  ;;  %288 = vmatmul.mubr.bf16.vlgmr.msra.gmra.mxu1 %v1581_v1 }
  0x23   :  { %331 = vmatpush1.bf16.msra.mxu0 %v1619_v2  ;;  %362 = vmatprep.mubr.bf16.mxu0 %v1581_v1 }
  0x24   :  { %332 = vmatprep.subr.bf16.mxu0 %v1625_v3  ;;  %372 = vmatpush1.bf16.msra.mxu1 %v1647_v7 }
  0x25   :  { %373 = vmatprep.subr.bf16.mxu1 %v1666_v10  ;;  %403 = vmatprep.mubr.bf16.mxu1 %v1581_v1 }
  0x27   :  { %333 = vmatpush1.bf16.msra.mxu0 %v1631_v4 }
  0x28   :  { %334 = vmatprep.subr.bf16.mxu0 %v1637_v5  ;;  %374 = vmatpush1.bf16.msra.mxu1 %v1671_v11 }
  0x29   :  { %375 = vmatprep.subr.bf16.mxu1 %v1688_v14 }
  0x2b   :  { %335 = vmatpush1.bf16.msra.mxu0 %v1653_v8 }
  0x2c   :  { %336 = vmatprep.subr.bf16.mxu0 %v1660_v9  ;;  %376 = vmatpush1.bf16.msra.mxu1 %v1695_v15 }
  0x2d   :  { %377 = vmatprep.subr.bf16.mxu1 %v1701_v16 }
  0x2f   :  { %337 = vmatpush1.bf16.msra.mxu0 %v1678_v12 }
  0x30   :  { %338 = vmatprep.subr.bf16.mxu0 %v1683_v13  ;;  %378 = vmatpush1.bf16.msra.mxu1 %v1719_v19 }
  0x31   :  { %379 = vmatprep.subr.bf16.mxu1 %v1725_v20 }
  0x33   :  { %339 = vmatpush1.bf16.msra.mxu0 %v1707_v17 }
  0x34   :  { %340 = vmatprep.subr.bf16.mxu0 %v1713_v18  ;;  %380 = vmatpush1.bf16.msra.mxu1 %v1743_v23 }
  0x35   :  { %381 = vmatprep.subr.bf16.mxu1 %v1749_v24 }
  0x37   :  { %341 = vmatpush1.bf16.msra.mxu0 %v1731_v21 }
  0x38   :  { %342 = vmatprep.subr.bf16.mxu0 %v1736_v22  ;;  %382 = vmatpush1.bf16.msra.mxu1 %v1767_v27 }
  0x39   :  { %383 = vmatprep.subr.bf16.mxu1 %v1773_v28 }
  0x3b   :  { %343 = vmatpush1.bf16.msra.mxu0 %v1755_v25 }
  0x3c   :  { %344 = vmatprep.subr.bf16.mxu0 %v1761_v26  ;;  %384 = vmatpush1.bf16.msra.mxu1 %v1786_v30 }
  0x3d   :  { %385 = vmatprep.subr.bf16.mxu1 %v1792_v31 }
  0x3f   :  { %345 = vmatpush1.bf16.msra.mxu0 %v1779_v29 }
  0x40   :  { %446 = vmatprep.subr.bf16.mxu0 %v1612_v0  ;;  %386 = vmatpush1.bf16.msra.mxu1 %v1799_v32 }
  0x41   :  { %487 = vmatprep.subr.bf16.mxu1 %v1642_v6 }
  0xe2   :  { %v248_v34 = vpop.f32.mrf.mxu0  ;;  %v289_v42 = vpop.f32.mrf.mxu1 }
  0xe3   :  { %v296_v36 = vadd.f32 %v248_v34, %v50_v33  ;;  %v298_v50 = vadd.f32 %v289_v42, %v52_v48 }
  0xe4   :  { %v250_v37 = vpop.f32.mrf.mxu0  ;;  %v291_v44 = vpop.f32.mrf.mxu1 }
  0xe5   :  { %v1266_v38 = vmul.f32 -1.442695, %v296_v36  ;;  %v297_v39 = vadd.f32 %v250_v37, %v51_v35  ;;  %v299_v49 = vadd.f32 %v291_v44, %v53_v45  ;;  %v1269_v37 = vld [vmem:[%s2284_s0 + $0x20] sm:$0xff] }
  0xe6   :  { %v252_v40 = vpop.f32.mrf.mxu0  ;;  %v293_v46 = vpop.f32.mrf.mxu1 }
  0xe7   :  { %1422 = vpow2.f32 %v1266_v38  ;;  %v1267_v41 = vmul.f32 -1.442695, %v297_v39  ;;  %v1268_v51 = vmul.f32 -1.442695, %v299_v49  ;;  %v1270_v40 = vld [vmem:[%s2284_s0 + $0x28] sm:$0xff] }
  0xe8   :  { %v253_v43 = vpop.f32.mrf.mxu0  ;;  %v294_v47 = vpop.f32.mrf.mxu1 }
  0xe9   :  { %1424 = vpow2.f32 %v1267_v41 }
  0xea   :  { %1426 = vtanh.f32 %v298_v50 }
  0xeb   :  { %1428 = vpow2.f32 %v1268_v51  ;;  %v1272_v51 = vld [vmem:[%s2284_s0 + $0x38] sm:$0xff] }
  0xf4   :  { %v1423_v52 = vpop.eup %1422 }
  0xf5   :  { %v303_v53 = vadd.f32 1.0, %v1423_v52 }
  0xf6   :  { %v1425_v54 = vpop.eup %1424 }
  0xf7   :  { %1430 = vrcp.f32 %v303_v53  ;;  %v309_v55 = vadd.f32 1.0, %v1425_v54  ;;  %v1427_v56 = vpop.eup %1426  ;;  %v1271_v53 = vld [vmem:[%s2284_s0 + $0x30] sm:$0xff] }
  0xf8   :  { %v1429_v57 = vpop.eup %1428 }
  0xf9   :  { %1432 = vrcp.f32 %v309_v55  ;;  %v316_v60 = vadd.f32 1.0, %v1429_v57 }
  0xfb   :  { %1434 = vrcp.f32 %v316_v60 }
 0x104   :  { %v1431_v58 = vpop.eup %1430 }
 0x105   :  { %v320_v62 = vmul.f32 %v1431_v58, %v1427_v56 }
 0x106   :  { %v1433_v59 = vpop.eup %1432 }
 0x107   :  { %v319_v61 = vmul.f32 0.0, %v1433_v59 }
 0x108   :  { %v1435_v33 = vpop.eup %1434 }
 0x109   :  { %v1853_v63 = vadd.f32 %v320_v62, %v319_v61 }
 0x10b   :  { %1436 = vtanh.f32 %v1853_v63 }
 0x118   :  { %v1437_v34 = vpop.eup %1436 }
 0x119   :  { %v323_v35 = vmul.f32 %v1437_v34, %v1435_v33 }
 0x11b   :  { %v329_v36 = vpack.c.bf16 %v323_v35, %v323_v35 }
 0x11d   :  { %363 = vmatmul.mubr.bf16.vlgmr.msra.gmra.mxu0 %v329_v36  ;;  %404 = vmatmul.mubr.bf16.vlgmr.msra.gmra.mxu1 %v329_v36 }
 0x11e   :  { %447 = vmatpush1.bf16.msra.mxu0 %v1619_v2  ;;  %488 = vmatpush1.bf16.msra.mxu1 %v1647_v7 }
 0x11f   :  { %448 = vmatprep.subr.bf16.mxu0 %v1625_v3  ;;  %489 = vmatprep.subr.bf16.mxu1 %v1666_v10 }
 0x120   :  { %478 = vmatprep.mubr.bf16.mxu0 %v1581_v1  ;;  %519 = vmatprep.mubr.bf16.mxu1 %v1581_v1 }
 0x122   :  { %449 = vmatpush1.bf16.msra.mxu0 %v1631_v4  ;;  %490 = vmatpush1.bf16.msra.mxu1 %v1671_v11 }
 0x123   :  { %450 = vmatprep.subr.bf16.mxu0 %v1637_v5  ;;  %491 = vmatprep.subr.bf16.mxu1 %v1688_v14 }
 0x126   :  { %451 = vmatpush1.bf16.msra.mxu0 %v1653_v8  ;;  %492 = vmatpush1.bf16.msra.mxu1 %v1695_v15 }
 0x127   :  { %452 = vmatprep.subr.bf16.mxu0 %v1660_v9  ;;  %493 = vmatprep.subr.bf16.mxu1 %v1701_v16 }
 0x12a   :  { %453 = vmatpush1.bf16.msra.mxu0 %v1678_v12  ;;  %494 = vmatpush1.bf16.msra.mxu1 %v1719_v19 }
 0x12b   :  { %454 = vmatprep.subr.bf16.mxu0 %v1683_v13  ;;  %495 = vmatprep.subr.bf16.mxu1 %v1725_v20 }
 0x12e   :  { %455 = vmatpush1.bf16.msra.mxu0 %v1707_v17  ;;  %496 = vmatpush1.bf16.msra.mxu1 %v1743_v23 }
 0x12f   :  { %456 = vmatprep.subr.bf16.mxu0 %v1713_v18  ;;  %497 = vmatprep.subr.bf16.mxu1 %v1749_v24 }
 0x132   :  { %457 = vmatpush1.bf16.msra.mxu0 %v1731_v21  ;;  %498 = vmatpush1.bf16.msra.mxu1 %v1767_v27 }
 0x133   :  { %458 = vmatprep.subr.bf16.mxu0 %v1736_v22  ;;  %499 = vmatprep.subr.bf16.mxu1 %v1773_v28 }
 0x136   :  { %459 = vmatpush1.bf16.msra.mxu0 %v1755_v25  ;;  %500 = vmatpush1.bf16.msra.mxu1 %v1786_v30 }
 0x137   :  { %460 = vmatprep.subr.bf16.mxu0 %v1761_v26  ;;  %501 = vmatprep.subr.bf16.mxu1 %v1792_v31 }
 0x13a   :  { %461 = vmatpush1.bf16.msra.mxu0 %v1779_v29  ;;  %502 = vmatpush1.bf16.msra.mxu1 %v1799_v32 }
 0x13b   :  { %562 = vmatprep.subr.bf16.mxu0 %v1612_v0  ;;  %603 = vmatprep.subr.bf16.mxu1 %v1642_v6 }
 0x1dd   :  { %v364_v38 = vpop.f32.mrf.mxu0  ;;  %v405_v39 = vpop.f32.mrf.mxu1 }
 0x1de   :  { %v412_v41 = vadd.f32 %v1269_v37, %v364_v38  ;;  %v414_v56 = vadd.f32 %v1271_v53, %v405_v39 }
 0x1df   :  { %v366_v42 = vpop.f32.mrf.mxu0  ;;  %v407_v43 = vpop.f32.mrf.mxu1 }
 0x1e0   :  { %v1273_v44 = vmul.f32 -1.442695, %v412_v41  ;;  %v413_v45 = vadd.f32 %v1270_v40, %v366_v42  ;;  %v415_v52 = vadd.f32 %v1272_v51, %v407_v43 }
 0x1e1   :  { %v368_v46 = vpop.f32.mrf.mxu0  ;;  %v409_v47 = vpop.f32.mrf.mxu1 }
 0x1e2   :  { %1438 = vpow2.f32 %v1273_v44  ;;  %v1274_v48 = vmul.f32 -1.442695, %v413_v45  ;;  %v1275_v54 = vmul.f32 -1.442695, %v415_v52  ;;  %v1277_v44 = vld [vmem:[%s2284_s0 + $0x48] sm:$0xff] }
 0x1e3   :  { %v369_v49 = vpop.f32.mrf.mxu0  ;;  %v410_v50 = vpop.f32.mrf.mxu1 }
 0x1e4   :  { %1440 = vpow2.f32 %v1274_v48 }
 0x1e5   :  { %1442 = vpow2.f32 %v1275_v54 }
 0x1ef   :  { %v1439_v55 = vpop.eup %1438 }
 0x1f0   :  { %v419_v57 = vadd.f32 1.0, %v1439_v55  ;;  %v1279_v55 = vld [vmem:[%s2284_s0 + $0x58] sm:$0xff] }
 0x1f1   :  { %v1441_v58 = vpop.eup %1440 }
 0x1f2   :  { %1444 = vrcp.f32 %v419_v57  ;;  %v425_v59 = vadd.f32 1.0, %v1441_v58  ;;  %v1443_v60 = vpop.eup %1442  ;;  %v1278_v57 = vld [vmem:[%s2284_s0 + $0x50] sm:$0xff] }
 0x1f3   :  { %1446 = vtanh.f32 %v414_v56  ;;  %v432_v34 = vadd.f32 1.0, %v1443_v60 }
 0x1f4   :  { %1448 = vrcp.f32 %v425_v59 }
 0x1f5   :  { %1450 = vrcp.f32 %v432_v34 }
 0x1ff   :  { %v1445_v61 = vpop.eup %1444 }
 0x200   :  { %v1447_v62 = vpop.eup %1446 }
 0x201   :  { %v1449_v33 = vpop.eup %1448  ;;  %v436_v35 = vmul.f32 %v1447_v62, %v1445_v61 }
 0x202   :  { %v435_v36 = vmul.f32 %v1449_v33, %v1853_v63  ;;  %v1451_v38 = vpop.eup %1450  ;;  %v1276_v63 = vld [vmem:[%s2284_s0 + $0x40] sm:$0xff] }
 0x204   :  { %v1903_v37 = vadd.f32 %v436_v35, %v435_v36 }
 0x206   :  { %1452 = vtanh.f32 %v1903_v37 }
 0x213   :  { %v1453_v39 = vpop.eup %1452 }
 0x214   :  { %v439_v40 = vmul.f32 %v1453_v39, %v1451_v38 }
 0x216   :  { %v445_v41 = vpack.c.bf16 %v439_v40, %v439_v40 }
 0x218   :  { %479 = vmatmul.mubr.bf16.vlgmr.msra.gmra.mxu0 %v445_v41  ;;  %520 = vmatmul.mubr.bf16.vlgmr.msra.gmra.mxu1 %v445_v41 }
 0x219   :  { %563 = vmatpush1.bf16.msra.mxu0 %v1619_v2  ;;  %604 = vmatpush1.bf16.msra.mxu1 %v1647_v7 }
 0x21a   :  { %564 = vmatprep.subr.bf16.mxu0 %v1625_v3  ;;  %605 = vmatprep.subr.bf16.mxu1 %v1666_v10 }
 0x21b   :  { %594 = vmatprep.mubr.bf16.mxu0 %v1581_v1  ;;  %635 = vmatprep.mubr.bf16.mxu1 %v1581_v1 }
 0x21d   :  { %565 = vmatpush1.bf16.msra.mxu0 %v1631_v4  ;;  %606 = vmatpush1.bf16.msra.mxu1 %v1671_v11 }
 0x21e   :  { %566 = vmatprep.subr.bf16.mxu0 %v1637_v5  ;;  %607 = vmatprep.subr.bf16.mxu1 %v1688_v14 }
 0x221   :  { %567 = vmatpush1.bf16.msra.mxu0 %v1653_v8  ;;  %608 = vmatpush1.bf16.msra.mxu1 %v1695_v15 }
 0x222   :  { %568 = vmatprep.subr.bf16.mxu0 %v1660_v9  ;;  %609 = vmatprep.subr.bf16.mxu1 %v1701_v16 }
 0x225   :  { %569 = vmatpush1.bf16.msra.mxu0 %v1678_v12  ;;  %610 = vmatpush1.bf16.msra.mxu1 %v1719_v19 }
 0x226   :  { %570 = vmatprep.subr.bf16.mxu0 %v1683_v13  ;;  %611 = vmatprep.subr.bf16.mxu1 %v1725_v20 }
 0x229   :  { %571 = vmatpush1.bf16.msra.mxu0 %v1707_v17  ;;  %612 = vmatpush1.bf16.msra.mxu1 %v1743_v23 }
 0x22a   :  { %572 = vmatprep.subr.bf16.mxu0 %v1713_v18  ;;  %613 = vmatprep.subr.bf16.mxu1 %v1749_v24 }
 0x22d   :  { %573 = vmatpush1.bf16.msra.mxu0 %v1731_v21  ;;  %614 = vmatpush1.bf16.msra.mxu1 %v1767_v27 }
 0x22e   :  { %574 = vmatprep.subr.bf16.mxu0 %v1736_v22  ;;  %615 = vmatprep.subr.bf16.mxu1 %v1773_v28 }
 0x231   :  { %575 = vmatpush1.bf16.msra.mxu0 %v1755_v25  ;;  %616 = vmatpush1.bf16.msra.mxu1 %v1786_v30 }
 0x232   :  { %576 = vmatprep.subr.bf16.mxu0 %v1761_v26  ;;  %617 = vmatprep.subr.bf16.mxu1 %v1792_v31 }
 0x235   :  { %577 = vmatpush1.bf16.msra.mxu0 %v1779_v29  ;;  %618 = vmatpush1.bf16.msra.mxu1 %v1799_v32 }
 0x236   :  { %678 = vmatprep.subr.bf16.mxu0 %v1612_v0  ;;  %719 = vmatprep.subr.bf16.mxu1 %v1642_v6 }
 0x2d8   :  { %v480_v42 = vpop.f32.mrf.mxu0  ;;  %v521_v43 = vpop.f32.mrf.mxu1 }
 0x2d9   :  { %v528_v45 = vadd.f32 %v1276_v63, %v480_v42  ;;  %v530_v60 = vadd.f32 %v1278_v57, %v521_v43 }
 0x2da   :  { %v482_v46 = vpop.f32.mrf.mxu0  ;;  %v523_v47 = vpop.f32.mrf.mxu1 }
 0x2db   :  { %v1280_v48 = vmul.f32 -1.442695, %v528_v45  ;;  %v529_v49 = vadd.f32 %v1277_v44, %v482_v46  ;;  %v531_v56 = vadd.f32 %v1279_v55, %v523_v47 }
 0x2dc   :  { %v484_v50 = vpop.f32.mrf.mxu0  ;;  %v525_v51 = vpop.f32.mrf.mxu1 }
 0x2dd   :  { %1454 = vpow2.f32 %v1280_v48  ;;  %v1281_v52 = vmul.f32 -1.442695, %v529_v49  ;;  %v1282_v58 = vmul.f32 -1.442695, %v531_v56  ;;  %v1284_v48 = vld [vmem:[%s2284_s0 + $0x68] sm:$0xff] }
 0x2de   :  { %v485_v53 = vpop.f32.mrf.mxu0  ;;  %v526_v54 = vpop.f32.mrf.mxu1 }
 0x2df   :  { %1456 = vpow2.f32 %v1281_v52 }
 0x2e0   :  { %1458 = vpow2.f32 %v1282_v58 }
 0x2ea   :  { %v1455_v59 = vpop.eup %1454 }
 0x2eb   :  { %v535_v61 = vadd.f32 1.0, %v1455_v59  ;;  %v1286_v59 = vld [vmem:[%s2284_s0 + $0x78] sm:$0xff] }
 0x2ec   :  { %v1457_v62 = vpop.eup %1456 }
 0x2ed   :  { %1460 = vrcp.f32 %v535_v61  ;;  %v541_v33 = vadd.f32 1.0, %v1457_v62  ;;  %v1459_v34 = vpop.eup %1458  ;;  %v1285_v61 = vld [vmem:[%s2284_s0 + $0x70] sm:$0xff] }
 0x2ee   :  { %1462 = vtanh.f32 %v530_v60  ;;  %v548_v39 = vadd.f32 1.0, %v1459_v34 }
 0x2ef   :  { %1464 = vrcp.f32 %v541_v33 }
 0x2f0   :  { %1466 = vrcp.f32 %v548_v39 }
 0x2fa   :  { %v1461_v35 = vpop.eup %1460 }
 0x2fb   :  { %v1463_v36 = vpop.eup %1462 }
 0x2fc   :  { %v1465_v38 = vpop.eup %1464  ;;  %v552_v40 = vmul.f32 %v1463_v36, %v1461_v35 }
 0x2fd   :  { %v551_v41 = vmul.f32 %v1465_v38, %v1903_v37  ;;  %v1467_v42 = vpop.eup %1466  ;;  %v1283_v37 = vld [vmem:[%s2284_s0 + $0x60] sm:$0xff] }
 0x2ff   :  { %v1953_v63 = vadd.f32 %v552_v40, %v551_v41 }
 0x301   :  { %1468 = vtanh.f32 %v1953_v63 }
 0x30e   :  { %v1469_v43 = vpop.eup %1468 }
 0x30f   :  { %v555_v44 = vmul.f32 %v1469_v43, %v1467_v42 }
 0x311   :  { %v561_v45 = vpack.c.bf16 %v555_v44, %v555_v44 }
 0x313   :  { %595 = vmatmul.mubr.bf16.vlgmr.msra.gmra.mxu0 %v561_v45  ;;  %636 = vmatmul.mubr.bf16.vlgmr.msra.gmra.mxu1 %v561_v45 }
 0x314   :  { %679 = vmatpush1.bf16.msra.mxu0 %v1619_v2  ;;  %720 = vmatpush1.bf16.msra.mxu1 %v1647_v7 }
 0x315   :  { %680 = vmatprep.subr.bf16.mxu0 %v1625_v3  ;;  %721 = vmatprep.subr.bf16.mxu1 %v1666_v10 }
 0x316   :  { %710 = vmatprep.mubr.bf16.mxu0 %v1581_v1  ;;  %751 = vmatprep.mubr.bf16.mxu1 %v1581_v1 }
 0x318   :  { %681 = vmatpush1.bf16.msra.mxu0 %v1631_v4  ;;  %722 = vmatpush1.bf16.msra.mxu1 %v1671_v11 }
 0x319   :  { %682 = vmatprep.subr.bf16.mxu0 %v1637_v5  ;;  %723 = vmatprep.subr.bf16.mxu1 %v1688_v14 }
 0x31c   :  { %683 = vmatpush1.bf16.msra.mxu0 %v1653_v8  ;;  %724 = vmatpush1.bf16.msra.mxu1 %v1695_v15 }
 0x31d   :  { %684 = vmatprep.subr.bf16.mxu0 %v1660_v9  ;;  %725 = vmatprep.subr.bf16.mxu1 %v1701_v16 }
 0x320   :  { %685 = vmatpush1.bf16.msra.mxu0 %v1678_v12  ;;  %726 = vmatpush1.bf16.msra.mxu1 %v1719_v19 }
 0x321   :  { %686 = vmatprep.subr.bf16.mxu0 %v1683_v13  ;;  %727 = vmatprep.subr.bf16.mxu1 %v1725_v20 }
 0x324   :  { %687 = vmatpush1.bf16.msra.mxu0 %v1707_v17  ;;  %728 = vmatpush1.bf16.msra.mxu1 %v1743_v23 }
 0x325   :  { %688 = vmatprep.subr.bf16.mxu0 %v1713_v18  ;;  %729 = vmatprep.subr.bf16.mxu1 %v1749_v24 }
 0x328   :  { %689 = vmatpush1.bf16.msra.mxu0 %v1731_v21  ;;  %730 = vmatpush1.bf16.msra.mxu1 %v1767_v27 }
 0x329   :  { %690 = vmatprep.subr.bf16.mxu0 %v1736_v22  ;;  %731 = vmatprep.subr.bf16.mxu1 %v1773_v28 }
 0x32c   :  { %691 = vmatpush1.bf16.msra.mxu0 %v1755_v25  ;;  %732 = vmatpush1.bf16.msra.mxu1 %v1786_v30 }
 0x32d   :  { %692 = vmatprep.subr.bf16.mxu0 %v1761_v26  ;;  %733 = vmatprep.subr.bf16.mxu1 %v1792_v31 }
 0x330   :  { %693 = vmatpush1.bf16.msra.mxu0 %v1779_v29  ;;  %734 = vmatpush1.bf16.msra.mxu1 %v1799_v32 }
 0x331   :  { %794 = vmatprep.subr.bf16.mxu0 %v1612_v0  ;;  %835 = vmatprep.subr.bf16.mxu1 %v1642_v6 }
 0x3d3   :  { %v596_v46 = vpop.f32.mrf.mxu0  ;;  %v637_v47 = vpop.f32.mrf.mxu1 }
 0x3d4   :  { %v644_v49 = vadd.f32 %v1283_v37, %v596_v46  ;;  %v646_v34 = vadd.f32 %v1285_v61, %v637_v47 }
 0x3d5   :  { %v598_v50 = vpop.f32.mrf.mxu0  ;;  %v639_v51 = vpop.f32.mrf.mxu1 }
 0x3d6   :  { %v1287_v52 = vmul.f32 -1.442695, %v644_v49  ;;  %v645_v53 = vadd.f32 %v1284_v48, %v598_v50  ;;  %v647_v60 = vadd.f32 %v1286_v59, %v639_v51 }
 0x3d7   :  { %v600_v54 = vpop.f32.mrf.mxu0  ;;  %v641_v55 = vpop.f32.mrf.mxu1 }
 0x3d8   :  { %1470 = vpow2.f32 %v1287_v52  ;;  %v1288_v56 = vmul.f32 -1.442695, %v645_v53  ;;  %v1289_v62 = vmul.f32 -1.442695, %v647_v60  ;;  %v1291_v52 = vld [vmem:[%s2284_s0 + $0x88] sm:$0xff] }
 0x3d9   :  { %v601_v57 = vpop.f32.mrf.mxu0  ;;  %v642_v58 = vpop.f32.mrf.mxu1 }
 0x3da   :  { %1472 = vpow2.f32 %v1288_v56 }
 0x3db   :  { %1474 = vpow2.f32 %v1289_v62  ;;  %v1293_v62 = vld [vmem:[%s2284_s0 + $0x98] sm:$0xff] }
 0x3e5   :  { %v1471_v33 = vpop.eup %1470 }
 0x3e6   :  { %v651_v35 = vadd.f32 1.0, %v1471_v33 }
 0x3e7   :  { %v1473_v36 = vpop.eup %1472 }
 0x3e8   :  { %1476 = vrcp.f32 %v651_v35  ;;  %v657_v38 = vadd.f32 1.0, %v1473_v36  ;;  %v1475_v39 = vpop.eup %1474 }
 0x3e9   :  { %1478 = vtanh.f32 %v646_v34  ;;  %v664_v43 = vadd.f32 1.0, %v1475_v39  ;;  %v1292_v34 = vld [vmem:[%s2284_s0 + $0x90] sm:$0xff] }
 0x3ea   :  { %1480 = vrcp.f32 %v657_v38 }
 0x3eb   :  { %1482 = vrcp.f32 %v664_v43 }
 0x3f5   :  { %v1477_v40 = vpop.eup %1476 }
 0x3f6   :  { %v1479_v41 = vpop.eup %1478 }
 0x3f7   :  { %v1481_v42 = vpop.eup %1480  ;;  %v668_v44 = vmul.f32 %v1479_v41, %v1477_v40 }
 0x3f8   :  { %v667_v45 = vmul.f32 %v1481_v42, %v1953_v63  ;;  %v1483_v46 = vpop.eup %1482  ;;  %v1290_v63 = vld [vmem:[%s2284_s0 + $0x80] sm:$0xff] }
 0x3fa   :  { %v2003_v37 = vadd.f32 %v668_v44, %v667_v45 }
 0x3fc   :  { %1484 = vtanh.f32 %v2003_v37 }
 0x409   :  { %v1485_v47 = vpop.eup %1484 }
 0x40a   :  { %v671_v48 = vmul.f32 %v1485_v47, %v1483_v46 }
 0x40c   :  { %v677_v49 = vpack.c.bf16 %v671_v48, %v671_v48 }
 0x40e   :  { %711 = vmatmul.mubr.bf16.vlgmr.msra.gmra.mxu0 %v677_v49  ;;  %752 = vmatmul.mubr.bf16.vlgmr.msra.gmra.mxu1 %v677_v49 }
 0x40f   :  { %795 = vmatpush1.bf16.msra.mxu0 %v1619_v2  ;;  %836 = vmatpush1.bf16.msra.mxu1 %v1647_v7 }
 0x410   :  { %796 = vmatprep.subr.bf16.mxu0 %v1625_v3  ;;  %837 = vmatprep.subr.bf16.mxu1 %v1666_v10 }
 0x411   :  { %826 = vmatprep.mubr.bf16.mxu0 %v1581_v1  ;;  %867 = vmatprep.mubr.bf16.mxu1 %v1581_v1 }
 0x413   :  { %797 = vmatpush1.bf16.msra.mxu0 %v1631_v4  ;;  %838 = vmatpush1.bf16.msra.mxu1 %v1671_v11 }
 0x414   :  { %798 = vmatprep.subr.bf16.mxu0 %v1637_v5  ;;  %839 = vmatprep.subr.bf16.mxu1 %v1688_v14 }
 0x417   :  { %799 = vmatpush1.bf16.msra.mxu0 %v1653_v8  ;;  %840 = vmatpush1.bf16.msra.mxu1 %v1695_v15 }
 0x418   :  { %800 = vmatprep.subr.bf16.mxu0 %v1660_v9  ;;  %841 = vmatprep.subr.bf16.mxu1 %v1701_v16 }
 0x41b   :  { %801 = vmatpush1.bf16.msra.mxu0 %v1678_v12  ;;  %842 = vmatpush1.bf16.msra.mxu1 %v1719_v19 }
 0x41c   :  { %802 = vmatprep.subr.bf16.mxu0 %v1683_v13  ;;  %843 = vmatprep.subr.bf16.mxu1 %v1725_v20 }
 0x41f   :  { %803 = vmatpush1.bf16.msra.mxu0 %v1707_v17  ;;  %844 = vmatpush1.bf16.msra.mxu1 %v1743_v23 }
 0x420   :  { %804 = vmatprep.subr.bf16.mxu0 %v1713_v18  ;;  %845 = vmatprep.subr.bf16.mxu1 %v1749_v24 }
 0x423   :  { %805 = vmatpush1.bf16.msra.mxu0 %v1731_v21  ;;  %846 = vmatpush1.bf16.msra.mxu1 %v1767_v27 }
 0x424   :  { %806 = vmatprep.subr.bf16.mxu0 %v1736_v22  ;;  %847 = vmatprep.subr.bf16.mxu1 %v1773_v28 }
 0x427   :  { %807 = vmatpush1.bf16.msra.mxu0 %v1755_v25  ;;  %848 = vmatpush1.bf16.msra.mxu1 %v1786_v30 }
 0x428   :  { %808 = vmatprep.subr.bf16.mxu0 %v1761_v26  ;;  %849 = vmatprep.subr.bf16.mxu1 %v1792_v31 }
 0x42b   :  { %809 = vmatpush1.bf16.msra.mxu0 %v1779_v29  ;;  %850 = vmatpush1.bf16.msra.mxu1 %v1799_v32 }
 0x42c   :  { %910 = vmatprep.subr.bf16.mxu0 %v1612_v0  ;;  %951 = vmatprep.subr.bf16.mxu1 %v1642_v6 }
 0x4ce   :  { %v712_v50 = vpop.f32.mrf.mxu0  ;;  %v753_v51 = vpop.f32.mrf.mxu1 }
 0x4cf   :  { %v760_v53 = vadd.f32 %v1290_v63, %v712_v50  ;;  %v762_v38 = vadd.f32 %v1292_v34, %v753_v51  ;;  %v1560_v34 = vld [vmem:[%s2283_s1 + $0xa8] ss:$16 sps:$4 sm:$0xff]  }
 0x4d0   :  { %v714_v54 = vpop.f32.mrf.mxu0  ;;  %v755_v55 = vpop.f32.mrf.mxu1 }
 0x4d1   :  { %v1294_v56 = vmul.f32 -1.442695, %v760_v53  ;;  %v761_v57 = vadd.f32 %v1291_v52, %v714_v54  ;;  %v763_v33 = vadd.f32 %v1293_v62, %v755_v55  ;;  %v1557_v62 = vld [vmem:[%s2283_s1 + $0xa4] ss:$16 sps:$4 sm:$0xff]  }
 0x4d2   :  { %v716_v58 = vpop.f32.mrf.mxu0  ;;  %v757_v59 = vpop.f32.mrf.mxu1 }
 0x4d3   :  { %1486 = vpow2.f32 %v1294_v56  ;;  %v1295_v0 = vmul.f32 -1.442695, %v761_v57  ;;  %v1296_v35 = vmul.f32 -1.442695, %v763_v33  ;;  %v1551_v57 = vld [vmem:[%s2283_s1 + $0xe0] ss:$16 sps:$4 sm:$0xff]  }
 0x4d4   :  { %v717_v60 = vpop.f32.mrf.mxu0  ;;  %v758_v61 = vpop.f32.mrf.mxu1  ;;  %v1552_v58 = vld [vmem:[%s2283_s1 + $0xe8] ss:$16 sps:$4 sm:$0xff]   ;;  %v1553_v59 = vld [vmem:[%s2283_s1 + $0xc4] ss:$16 sps:$4 sm:$0xff]   ;;  %v1558_v33 = vld [vmem:[%s2283_s1 + $0xac] ss:$16 sps:$4 sm:$0xff]  }
 0x4d5   :  { %1488 = vpow2.f32 %v1295_v0  ;;  %v1554_v0 = vld [vmem:[%s2283_s1 + $0xcc] ss:$16 sps:$4 sm:$0xff]   ;;  %v1555_v60 = vld [vmem:[%s2283_s1 + $0xc0] ss:$16 sps:$4 sm:$0xff]   ;;  %v1556_v61 = vld [vmem:[%s2283_s1 + $0xc8] ss:$16 sps:$4 sm:$0xff]  }
 0x4d6   :  { %1490 = vpow2.f32 %v1296_v35  ;;  %v1561_v35 = vld [vmem:[%s2283_s1 + $0x84] ss:$16 sps:$4 sm:$0xff]  }
 0x4e0   :  { %v1487_v36 = vpop.eup %1486 }
 0x4e1   :  { %v767_v39 = vadd.f32 1.0, %v1487_v36  ;;  %v1562_v36 = vld [vmem:[%s2283_s1 + $0x8c] ss:$16 sps:$4 sm:$0xff]  }
 0x4e2   :  { %v1489_v40 = vpop.eup %1488 }
 0x4e3   :  { %1492 = vrcp.f32 %v767_v39  ;;  %v773_v41 = vadd.f32 1.0, %v1489_v40  ;;  %v1491_v42 = vpop.eup %1490  ;;  %v1564_v39 = vld [vmem:[%s2283_s1 + $0x88] ss:$16 sps:$4 sm:$0xff]   ;;  %v1565_v40 = vld [vmem:[%s2283_s1 + $0x64] ss:$16 sps:$4 sm:$0xff]  }
 0x4e4   :  { %1494 = vtanh.f32 %v762_v38  ;;  %v780_v46 = vadd.f32 1.0, %v1491_v42  ;;  %v1563_v38 = vld [vmem:[%s2283_s1 + $0x80] ss:$16 sps:$4 sm:$0xff]  }
 0x4e5   :  { %1496 = vrcp.f32 %v773_v41  ;;  %v1566_v41 = vld [vmem:[%s2283_s1 + $0x6c] ss:$16 sps:$4 sm:$0xff]   ;;  %v1567_v42 = vld [vmem:[%s2283_s1 + $0x60] ss:$16 sps:$4 sm:$0xff]  }
 0x4e6   :  { %1498 = vrcp.f32 %v780_v46  ;;  %v1571_v46 = vld [vmem:[%s2283_s1 + $0x40] ss:$16 sps:$4 sm:$0xff]  }
 0x4f0   :  { %v1493_v43 = vpop.eup %1492 }
 0x4f1   :  { %v1495_v44 = vpop.eup %1494 }
 0x4f2   :  { %v1497_v45 = vpop.eup %1496  ;;  %v784_v47 = vmul.f32 %v1495_v44, %v1493_v43  ;;  %v1568_v43 = vld [vmem:[%s2283_s1 + $0x68] ss:$16 sps:$4 sm:$0xff]   ;;  %v1569_v44 = vld [vmem:[%s2283_s1 + $0x44] ss:$16 sps:$4 sm:$0xff]  }
 0x4f3   :  { %v783_v48 = vmul.f32 %v1497_v45, %v2003_v37  ;;  %v1499_v63 = vpop.eup %1498  ;;  %v1570_v45 = vld [vmem:[%s2283_s1 + $0x4c] ss:$16 sps:$4 sm:$0xff]  }
 0x4f5   :  { %v2053_v49 = vadd.f32 %v784_v47, %v783_v48  ;;  %v1572_v47 = vld [vmem:[%s2283_s1 + $0x48] ss:$16 sps:$4 sm:$0xff]   ;;  %v1573_v48 = vld [vmem:[%s2283_s1 + $0x24] ss:$16 sps:$4 sm:$0xff]  }
 0x4f7   :  { %1500 = vtanh.f32 %v2053_v49 }
 0x504   :  { %v1501_v50 = vpop.eup %1500 }
 0x505   :  { %v787_v51 = vmul.f32 %v1501_v50, %v1499_v63  ;;  %v1575_v63 = vld [vmem:[%s2283_s1 + $0x20] ss:$16 sps:$4 sm:$0xff]   ;;  %v1576_v50 = vld [vmem:[%s2283_s1 + $0x28] ss:$16 sps:$4 sm:$0xff]  }
 0x507   :  { %v793_v52 = vpack.c.bf16 %v787_v51, %v787_v51  ;;  %v1577_v51 = vld [vmem:[%s2283_s1 + $0x4] ss:$16 sps:$4 sm:$0xff]  }
 0x509   :  { %827 = vmatmul.mubr.bf16.vlgmr.msra.gmra.mxu0 %v793_v52  ;;  %868 = vmatmul.mubr.bf16.vlgmr.msra.gmra.mxu1 %v793_v52  ;;  %v1578_v52 = vld [vmem:[%s2283_s1 + $0xc] ss:$16 sps:$4 sm:$0xff]  }
 0x50a   :  { %911 = vmatpush1.bf16.msra.mxu0 %v1619_v2  ;;  %952 = vmatpush1.bf16.msra.mxu1 %v1647_v7  ;;  %v1550_v2 = vld [vmem:[%s2283_s1 + $0xe4] ss:$16 sps:$4 sm:$0xff]   ;;  %v1298_v7 = vld [vmem:[%s2284_s0 + $0xa8] sm:$0xff] }
 0x50b   :  { %912 = vmatprep.subr.bf16.mxu0 %v1625_v3  ;;  %953 = vmatprep.subr.bf16.mxu1 %v1666_v10  ;;  %v1297_v3 = vld [vmem:[%s2284_s0 + $0xa0] sm:$0xff] }
 0x50c   :  { %942 = vmatprep.mubr.bf16.mxu0 %v1581_v1  ;;  %983 = vmatprep.mubr.bf16.mxu1 %v1581_v1 }
 0x50e   :  { %913 = vmatpush1.bf16.msra.mxu0 %v1631_v4  ;;  %954 = vmatpush1.bf16.msra.mxu1 %v1671_v11 }
 0x50f   :  { %914 = vmatprep.subr.bf16.mxu0 %v1637_v5  ;;  %955 = vmatprep.subr.bf16.mxu1 %v1688_v14 }
 0x512   :  { %915 = vmatpush1.bf16.msra.mxu0 %v1653_v8  ;;  %956 = vmatpush1.bf16.msra.mxu1 %v1695_v15 }
 0x513   :  { %916 = vmatprep.subr.bf16.mxu0 %v1660_v9  ;;  %957 = vmatprep.subr.bf16.mxu1 %v1701_v16 }
 0x516   :  { %917 = vmatpush1.bf16.msra.mxu0 %v1678_v12  ;;  %958 = vmatpush1.bf16.msra.mxu1 %v1719_v19  ;;  %v1299_v19 = vld [vmem:[%s2284_s0 + $0xb0] sm:$0xff] }
 0x517   :  { %918 = vmatprep.subr.bf16.mxu0 %v1683_v13  ;;  %959 = vmatprep.subr.bf16.mxu1 %v1725_v20 }
 0x51a   :  { %919 = vmatpush1.bf16.msra.mxu0 %v1707_v17  ;;  %960 = vmatpush1.bf16.msra.mxu1 %v1743_v23  ;;  %v1300_v17 = vld [vmem:[%s2284_s0 + $0xb8] sm:$0xff] }
 0x51b   :  { %920 = vmatprep.subr.bf16.mxu0 %v1713_v18  ;;  %961 = vmatprep.subr.bf16.mxu1 %v1749_v24 }
 0x51e   :  { %921 = vmatpush1.bf16.msra.mxu0 %v1731_v21  ;;  %962 = vmatpush1.bf16.msra.mxu1 %v1767_v27 }
 0x51f   :  { %922 = vmatprep.subr.bf16.mxu0 %v1736_v22  ;;  %963 = vmatprep.subr.bf16.mxu1 %v1773_v28 }
 0x522   :  { %923 = vmatpush1.bf16.msra.mxu0 %v1755_v25  ;;  %964 = vmatpush1.bf16.msra.mxu1 %v1786_v30 }
 0x523   :  { %924 = vmatprep.subr.bf16.mxu0 %v1761_v26  ;;  %965 = vmatprep.subr.bf16.mxu1 %v1792_v31 }
 0x526   :  { %925 = vmatpush1.bf16.msra.mxu0 %v1779_v29  ;;  %966 = vmatpush1.bf16.msra.mxu1 %v1799_v32 }
 0x527   :  { %1026 = vmatprep.subr.bf16.mxu0 %v1550_v2  ;;  %1067 = vmatprep.subr.bf16.mxu1 %v1642_v6  ;;  %v1579_v2 = vld [vmem:[%s2283_s1] ss:$16 sps:$4 sm:$0xff]  }
 0x5c9   :  { %v828_v4 = vpop.f32.mrf.mxu0  ;;  %v869_v5 = vpop.f32.mrf.mxu1 }
 0x5ca   :  { %v876_v8 = vadd.f32 %v1297_v3, %v828_v4  ;;  %v878_v22 = vadd.f32 %v1299_v19, %v869_v5  ;;  %v1580_v3 = vld [vmem:[%s2283_s1 + $0x8] ss:$16 sps:$4 sm:$0xff]   ;;  %v1304_v4 = vld [vmem:[%s2284_s0 + $0xc0] sm:$0xff] }
 0x5cb   :  { %v830_v9 = vpop.f32.mrf.mxu0  ;;  %v871_v10 = vpop.f32.mrf.mxu1 }
 0x5cc   :  { %v1301_v11 = vmul.f32 -1.442695, %v876_v8  ;;  %v877_v12 = vadd.f32 %v1298_v7, %v830_v9  ;;  %v879_v18 = vadd.f32 %v1300_v17, %v871_v10  ;;  %v1305_v8 = vld [vmem:[%s2284_s0 + $0xc8] sm:$0xff] }
 0x5cd   :  { %v832_v13 = vpop.f32.mrf.mxu0  ;;  %v873_v14 = vpop.f32.mrf.mxu1 }
 0x5ce   :  { %1502 = vpow2.f32 %v1301_v11  ;;  %v1302_v15 = vmul.f32 -1.442695, %v877_v12  ;;  %v1303_v20 = vmul.f32 -1.442695, %v879_v18  ;;  %v1307_v18 = vld [vmem:[%s2284_s0 + $0xd8] sm:$0xff] }
 0x5cf   :  { %v833_v6 = vpop.f32.mrf.mxu0  ;;  %v874_v16 = vpop.f32.mrf.mxu1 }
 0x5d0   :  { %1504 = vpow2.f32 %v1302_v15 }
 0x5d1   :  { %1506 = vpow2.f32 %v1303_v20  ;;  %v1306_v20 = vld [vmem:[%s2284_s0 + $0xd0] sm:$0xff] }
 0x5db   :  { %v1503_v21 = vpop.eup %1502 }
 0x5dc   :  { %v883_v23 = vadd.f32 1.0, %v1503_v21 }
 0x5dd   :  { %v1505_v24 = vpop.eup %1504 }
 0x5de   :  { %1508 = vrcp.f32 %v883_v23  ;;  %v889_v25 = vadd.f32 1.0, %v1505_v24  ;;  %v1507_v26 = vpop.eup %1506 }
 0x5df   :  { %1510 = vtanh.f32 %v878_v22  ;;  %v896_v30 = vadd.f32 1.0, %v1507_v26 }
 0x5e0   :  { %1512 = vrcp.f32 %v889_v25 }
 0x5e1   :  { %1514 = vrcp.f32 %v896_v30 }
 0x5eb   :  { %v1509_v27 = vpop.eup %1508 }
 0x5ec   :  { %v1511_v28 = vpop.eup %1510 }
 0x5ed   :  { %v1513_v29 = vpop.eup %1512  ;;  %v900_v31 = vmul.f32 %v1511_v28, %v1509_v27 }
 0x5ee   :  { %v899_v32 = vmul.f32 %v1513_v29, %v2053_v49  ;;  %v1515_v53 = vpop.eup %1514  ;;  %v1574_v49 = vld [vmem:[%s2283_s1 + $0x2c] ss:$16 sps:$4 sm:$0xff]  }
 0x5f0   :  { %v2105_v37 = vadd.f32 %v900_v31, %v899_v32 }
 0x5f2   :  { %1516 = vtanh.f32 %v2105_v37 }
 0x5ff   :  { %v1517_v54 = vpop.eup %1516 }
 0x600   :  { %v903_v55 = vmul.f32 %v1517_v54, %v1515_v53 }
 0x602   :  { %v909_v56 = vpack.c.bf16 %v903_v55, %v903_v55 }
 0x604   :  { %943 = vmatmul.mubr.bf16.vlgmr.msra.gmra.mxu0 %v909_v56  ;;  %984 = vmatmul.mubr.bf16.vlgmr.msra.gmra.mxu1 %v909_v56 }
 0x605   :  { %1027 = vmatpush1.bf16.msra.mxu0 %v1551_v57  ;;  %1068 = vmatpush1.bf16.msra.mxu1 %v1552_v58 }
 0x606   :  { %1028 = vmatprep.subr.bf16.mxu0 %v1553_v59  ;;  %1069 = vmatprep.subr.bf16.mxu1 %v1554_v0  ;;  %v1582_v59 = vmov 0.0   ;;  %v1151_v0 = vld [vmem:[%s2285_s2 + $0x78] sm:$0xff] }
 0x607   :  { %1058 = vmatprep.mubr.bf16.mxu0 %v1581_v1  ;;  %1099 = vmatprep.mubr.bf16.mxu1 %v1581_v1  ;;  %v1559_v1 = vld [vmem:[%s2283_s1 + $0xa0] ss:$16 sps:$4 sm:$0xff]  }
 0x609   :  { %1029 = vmatpush1.bf16.msra.mxu0 %v1555_v60  ;;  %1070 = vmatpush1.bf16.msra.mxu1 %v1556_v61  ;;  %v1149_v60 = vld [vmem:[%s2285_s2 + $0x68] sm:$0xff]  ;;  %v1148_v61 = vld [vmem:[%s2285_s2 + $0x60] sm:$0xff] }
 0x60a   :  { %1030 = vmatprep.subr.bf16.mxu0 %v1557_v62  ;;  %1071 = vmatprep.subr.bf16.mxu1 %v1558_v33  ;;  %v1147_v62 = vld [vmem:[%s2285_s2 + $0x58] sm:$0xff]  ;;  %v1146_v33 = vld [vmem:[%s2285_s2 + $0x50] sm:$0xff] }
 0x60d   :  { %1031 = vmatpush1.bf16.msra.mxu0 %v1559_v1  ;;  %1072 = vmatpush1.bf16.msra.mxu1 %v1560_v34  ;;  %v1145_v1 = vld [vmem:[%s2285_s2 + $0x48] sm:$0xff]  ;;  %v1144_v34 = vld [vmem:[%s2285_s2 + $0x40] sm:$0xff] }
 0x60e   :  { %1032 = vmatprep.subr.bf16.mxu0 %v1561_v35  ;;  %1073 = vmatprep.subr.bf16.mxu1 %v1562_v36  ;;  %v1143_v35 = vld [vmem:[%s2285_s2 + $0x38] sm:$0xff]  ;;  %v1142_v36 = vld [vmem:[%s2285_s2 + $0x30] sm:$0xff] }
 0x611   :  { %1033 = vmatpush1.bf16.msra.mxu0 %v1563_v38  ;;  %1074 = vmatpush1.bf16.msra.mxu1 %v1564_v39  ;;  %v1141_v38 = vld [vmem:[%s2285_s2 + $0x28] sm:$0xff]  ;;  %v1140_v39 = vld [vmem:[%s2285_s2 + $0x20] sm:$0xff] }
 0x612   :  { %1034 = vmatprep.subr.bf16.mxu0 %v1565_v40  ;;  %1075 = vmatprep.subr.bf16.mxu1 %v1566_v41  ;;  %v1139_v40 = vld [vmem:[%s2285_s2 + $0x18] sm:$0xff]  ;;  %v1138_v41 = vld [vmem:[%s2285_s2 + $0x10] sm:$0xff] }
 0x615   :  { %1035 = vmatpush1.bf16.msra.mxu0 %v1567_v42  ;;  %1076 = vmatpush1.bf16.msra.mxu1 %v1568_v43  ;;  %v1137_v42 = vld [vmem:[%s2285_s2 + $0x8] sm:$0xff]  ;;  %v1136_v43 = vld [vmem:[%s2285_s2] sm:$0xff] }
 0x616   :  { %1036 = vmatprep.subr.bf16.mxu0 %v1569_v44  ;;  %1077 = vmatprep.subr.bf16.mxu1 %v1570_v45  ;;  %v1311_v44 = vld [vmem:[%s2284_s0 + $0xe0] sm:$0xff] }
 0x619   :  { %1037 = vmatpush1.bf16.msra.mxu0 %v1571_v46  ;;  %1078 = vmatpush1.bf16.msra.mxu1 %v1572_v47  ;;  %v1312_v47 = vld [vmem:[%s2284_s0 + $0xe8] sm:$0xff] }
 0x61a   :  { %1038 = vmatprep.subr.bf16.mxu0 %v1573_v48  ;;  %1079 = vmatprep.subr.bf16.mxu1 %v1574_v49 }
 0x61d   :  { %1039 = vmatpush1.bf16.msra.mxu0 %v1575_v63  ;;  %1080 = vmatpush1.bf16.msra.mxu1 %v1576_v50 }
 0x61e   :  { %1040 = vmatprep.subr.bf16.mxu0 %v1577_v51  ;;  %1081 = vmatprep.subr.bf16.mxu1 %v1578_v52 }
 0x621   :  { %1041 = vmatpush1.bf16.msra.mxu0 %v1579_v2  ;;  %1082 = vmatpush1.bf16.msra.mxu1 %v1580_v3 }
 0x622   :  { %1336 = vmatprep.subr.mxu0 %v1582_v59 }
 0x6c4   :  { %v944_v5 = vpop.f32.mrf.mxu0  ;;  %v985_v7 = vpop.f32.mrf.mxu1 }
 0x6c5   :  { %v992_v9 = vadd.f32 %v1304_v4, %v944_v5  ;;  %v994_v23 = vadd.f32 %v1306_v20, %v985_v7  ;;  %v1314_v7 = vld [vmem:[%s2284_s0 + $0xf8] sm:$0xff] }
 0x6c6   :  { %v946_v10 = vpop.f32.mrf.mxu0  ;;  %v987_v11 = vpop.f32.mrf.mxu1 }
 0x6c7   :  { %v1308_v12 = vmul.f32 -1.442695, %v992_v9  ;;  %v993_v13 = vadd.f32 %v1305_v8, %v946_v10  ;;  %v995_v19 = vadd.f32 %v1307_v18, %v987_v11  ;;  %v1313_v9 = vld [vmem:[%s2284_s0 + $0xf0] sm:$0xff] }
 0x6c8   :  { %v948_v14 = vpop.f32.mrf.mxu0  ;;  %v989_v15 = vpop.f32.mrf.mxu1 }
 0x6c9   :  { %1518 = vpow2.f32 %v1308_v12  ;;  %v1309_v6 = vmul.f32 -1.442695, %v993_v13  ;;  %v1310_v21 = vmul.f32 -1.442695, %v995_v19 }
 0x6ca   :  { %v949_v16 = vpop.f32.mrf.mxu0  ;;  %v990_v17 = vpop.f32.mrf.mxu1 }
 0x6cb   :  { %1520 = vpow2.f32 %v1309_v6 }
 0x6cc   :  { %1522 = vpow2.f32 %v1310_v21 }
 0x6d6   :  { %v1519_v22 = vpop.eup %1518 }
 0x6d7   :  { %v999_v24 = vadd.f32 1.0, %v1519_v22 }
 0x6d8   :  { %v1521_v25 = vpop.eup %1520 }
 0x6d9   :  { %1524 = vrcp.f32 %v999_v24  ;;  %v1005_v26 = vadd.f32 1.0, %v1521_v25  ;;  %v1523_v27 = vpop.eup %1522 }
 0x6da   :  { %1526 = vtanh.f32 %v994_v23  ;;  %v1012_v31 = vadd.f32 1.0, %v1523_v27 }
 0x6db   :  { %1528 = vrcp.f32 %v1005_v26  ;;  %v1318_v26 = vld [vmem:[%s2286_s3] ss:$0 sm:$0xff] }
 0x6dc   :  { %1530 = vrcp.f32 %v1012_v31 }
 0x6e6   :  { %v1525_v28 = vpop.eup %1524 }
 0x6e7   :  { %v1527_v29 = vpop.eup %1526 }
 0x6e8   :  { %v1529_v30 = vpop.eup %1528  ;;  %v1016_v32 = vmul.f32 %v1527_v29, %v1525_v28 }
 0x6e9   :  { %v1015_v53 = vmul.f32 %v1529_v30, %v2105_v37  ;;  %v1531_v55 = vpop.eup %1530  ;;  %v1150_v37 = vld [vmem:[%s2285_s2 + $0x70] sm:$0xff] }
 0x6eb   :  { %v2213_v54 = vadd.f32 %v1016_v32, %v1015_v53 }
 0x6ed   :  { %1532 = vtanh.f32 %v2213_v54 }
 0x6fa   :  { %v1533_v56 = vpop.eup %1532 }
 0x6fb   :  { %v1019_v57 = vmul.f32 %v1533_v56, %v1531_v55 }
 0x6fd   :  { %v1025_v58 = vpack.c.bf16 %v1019_v57, %v1019_v57 }
 0x6ff   :  { %1059 = vmatmul.mubr.bf16.vlgmr.msra.gmra.mxu0 %v1025_v58  ;;  %1100 = vmatmul.mubr.bf16.vlgmr.msra.gmra.mxu1 %v1025_v58 }
 0x700   :  { %1337 = vmatpush3.msra.mxu0 %v1151_v0  ;;  %1368 = vmatprep.mubr.msk.f32.mxu0 %vm1583_vm0, %v1582_v59 }
 0x701   :  { %1338 = vmatprep.subr.mxu0 %v1582_v59 }
 0x702   :  { %1339 = vmatpush3.msra.mxu0 %v1150_v37 }
 0x703   :  { %1340 = vmatprep.subr.mxu0 %v1582_v59 }
 0x704   :  { %1341 = vmatpush3.msra.mxu0 %v1149_v60 }
 0x705   :  { %1342 = vmatprep.subr.mxu0 %v1582_v59 }
 0x706   :  { %1343 = vmatpush3.msra.mxu0 %v1148_v61 }
 0x707   :  { %1344 = vmatprep.subr.mxu0 %v1582_v59 }
 0x708   :  { %1345 = vmatpush3.msra.mxu0 %v1147_v62 }
 0x709   :  { %1346 = vmatprep.subr.mxu0 %v1582_v59 }
 0x70a   :  { %1347 = vmatpush3.msra.mxu0 %v1146_v33 }
 0x70b   :  { %1348 = vmatprep.subr.mxu0 %v1582_v59 }
 0x70c   :  { %1349 = vmatpush3.msra.mxu0 %v1145_v1 }
 0x70d   :  { %1350 = vmatprep.subr.mxu0 %v1582_v59 }
 0x70e   :  { %1351 = vmatpush3.msra.mxu0 %v1144_v34 }
 0x70f   :  { %1352 = vmatprep.subr.mxu0 %v1582_v59 }
 0x710   :  { %1353 = vmatpush3.msra.mxu0 %v1143_v35 }
 0x711   :  { %1354 = vmatprep.subr.mxu0 %v1582_v59 }
 0x712   :  { %1355 = vmatpush3.msra.mxu0 %v1142_v36 }
 0x713   :  { %1356 = vmatprep.subr.mxu0 %v1582_v59 }
 0x714   :  { %1357 = vmatpush3.msra.mxu0 %v1141_v38 }
 0x715   :  { %1358 = vmatprep.subr.mxu0 %v1582_v59 }
 0x716   :  { %1359 = vmatpush3.msra.mxu0 %v1140_v39 }
 0x717   :  { %1360 = vmatprep.subr.mxu0 %v1582_v59 }
 0x718   :  { %1361 = vmatpush3.msra.mxu0 %v1139_v40 }
 0x719   :  { %1362 = vmatprep.subr.mxu0 %v1582_v59 }
 0x71a   :  { %1363 = vmatpush3.msra.mxu0 %v1138_v41 }
 0x71b   :  { %1364 = vmatprep.subr.mxu0 %v1582_v59 }
 0x71c   :  { %1365 = vmatpush3.msra.mxu0 %v1137_v42 }
 0x71d   :  { %1366 = vmatprep.subr.mxu0 %v1582_v59 }
 0x71e   :  { %1367 = vmatpush3.msra.mxu0 %v1136_v43 }
 0x7bf   :  { %v1060_v45 = vpop.f32.mrf.mxu0  ;;  %v1101_v46 = vpop.f32.mrf.mxu1 }
 0x7c0   :  { %v1108_v48 = vadd.f32 %v1311_v44, %v1060_v45  ;;  %v1110_v12 = vadd.f32 %v1313_v9, %v1101_v46 }
 0x7c1   :  { %v1062_v49 = vpop.f32.mrf.mxu0  ;;  %v1103_v63 = vpop.f32.mrf.mxu1 }
 0x7c2   :  { %v1315_v50 = vmul.f32 -1.442695, %v1108_v48  ;;  %v1109_v51 = vadd.f32 %v1312_v47, %v1062_v49  ;;  %v1111_v8 = vadd.f32 %v1314_v7, %v1103_v63 }
 0x7c3   :  { %v1064_v52 = vpop.f32.mrf.mxu0  ;;  %v1105_v2 = vpop.f32.mrf.mxu1 }
 0x7c4   :  { %1534 = vpow2.f32 %v1315_v50  ;;  %v1316_v3 = vmul.f32 -1.442695, %v1109_v51  ;;  %v1317_v10 = vmul.f32 -1.442695, %v1111_v8 }
 0x7c5   :  { %v1065_v4 = vpop.f32.mrf.mxu0  ;;  %v1106_v5 = vpop.f32.mrf.mxu1 }
 0x7c6   :  { %1536 = vpow2.f32 %v1316_v3 }
 0x7c7   :  { %1538 = vpow2.f32 %v1317_v10 }
 0x7d1   :  { %v1535_v11 = vpop.eup %1534 }
 0x7d2   :  { %v1115_v13 = vadd.f32 1.0, %v1535_v11 }
 0x7d3   :  { %v1537_v14 = vpop.eup %1536 }
 0x7d4   :  { %1540 = vrcp.f32 %v1115_v13  ;;  %v1121_v15 = vadd.f32 1.0, %v1537_v14  ;;  %v1539_v6 = vpop.eup %1538 }
 0x7d5   :  { %1542 = vtanh.f32 %v1110_v12  ;;  %v1128_v19 = vadd.f32 1.0, %v1539_v6 }
 0x7d6   :  { %1544 = vrcp.f32 %v1121_v15 }
 0x7d7   :  { %1546 = vrcp.f32 %v1128_v19 }
 0x7e1   :  { %v1541_v16 = vpop.eup %1540 }
 0x7e2   :  { %v1543_v17 = vpop.eup %1542 }
 0x7e3   :  { %v1545_v18 = vpop.eup %1544  ;;  %v1132_v20 = vmul.f32 %v1543_v17, %v1541_v16 }
 0x7e4   :  { %v1131_v21 = vmul.f32 %v1545_v18, %v2213_v54  ;;  %v1547_v23 = vpop.eup %1546 }
 0x7e6   :  { %v1133_v22 = vadd.f32 %v1132_v20, %v1131_v21 }
 0x7e8   :  { %1548 = vtanh.f32 %v1133_v22 }
 0x7f5   :  { %v1549_v24 = vpop.eup %1548 }
 0x7f6   :  { %v1135_v25 = vmul.f32 %v1549_v24, %v1547_v23 }
 0x7f8   :  { %1369 = vmatmul.mubr.f32.vlgmr.msra.gmra.mxu0 %v1135_v25 }
 0x8b8   :  { %v1225_v27 = vpop.f32.mrf.mxu0 }
 0x8b9   :  { %v1226_v28 = vadd.f32 %v1318_v26, %v1225_v27 }
 0x8ba   :  { %v1370_v29 = vpop.f32.mrf.mxu0 }
 0x8bb   :  { %1229 = vst [vmem:[%s2287_s4] sm:$0xff] %v1226_v28 }

</bundles_post_ra>
